<compile_context>
chip_gen: v7x
topology: tpu7x:2x2x1
jax: 0.10.0
libtpu: 0.0.40
codegen_flags: <defaults>
</compile_context>

<pallas_src>
import jax
import jax.numpy as jnp
from jax.experimental import pallas as pl
from jax.experimental.pallas import tpu as pltpu

# Small shapes consistent with the module (hidden_size scaled down from 128).
B = 4          # batch
T = 8          # sequence length
IN = 1         # input_size
H = 32         # hidden_size
H2 = H // 2    # linear1 out features
OUT = 1        # output_size


def lstm_kernel(x_ref,
                wih0_ref, b0_ref, whh0_ref,
                w10_ref, b1_ref,
                w1_ref, bl1_ref, w2t_ref, bl2_ref,
                out_ref):
    x = x_ref[...]                # (B, T, IN), batch-first, IN == 1
    wih0 = wih0_ref[...]          # (IN, 4H)   gate lane order (i, f, o, g)
    b0 = b0_ref[...]              # (1, 4H)    combined b_ih0 + b_hh0
    whh0 = whh0_ref[...]          # (H, 4H)
    w10 = w10_ref[...]            # (2H, 4H)   rows = [wih1 ; whh1]
    b1 = b1_ref[...]              # (1, 4H)    combined b_ih1 + b_hh1

    # Hoisted layer-0 input projection for all T steps. IN == 1, so this is a
    # single VPU broadcast-multiply + bias add (no MXU, no per-step bias add).
    xproj = x * wih0[None, :, :] + b0[None, :, :]        # (B, T, 4H)

    # Hoisted layer-1 bias broadcast (done once, not once per step).
    b1b = jnp.broadcast_to(b1, (B, 4 * H))               # (B, 4H)

    def cell(gates, c):
        # gates lane order (i, f, o, g): one sigmoid over the contiguous 3H
        # slab, one tanh over the g slab (both on the EUP slot).
        sig = jax.nn.sigmoid(gates[:, :3 * H])
        i = sig[:, :H]
        f = sig[:, H:2 * H]
        o = sig[:, 2 * H:3 * H]
        g = jnp.tanh(gates[:, 3 * H:])
        c_new = f * c + i * g
        h_new = o * jnp.tanh(c_new)
        return h_new, c_new

    zeros = jnp.zeros((B, H), jnp.float32)
    h1, c1, h2, c2 = zeros, zeros, zeros, zeros

    # Fully unrolled recurrence (static Python loop -> static xproj slices);
    # h/c stay in vregs.
    for t in range(T):
        # layer 0: one (B,H)@(H,4H) MXU push per step
        gates0 = xproj[:, t, :] + jnp.dot(
            h1, whh0, preferred_element_type=jnp.float32)
        h1, c1 = cell(gates0, c1)
        # layer 1: fuse input (new h1) and recurrent (h2) paths into a single
        # (B,2H)@(2H,4H) MXU push
        gates1 = jnp.dot(jnp.concatenate([h1, h2], axis=1), w10,
                         preferred_element_type=jnp.float32) + b1b
        h2, c2 = cell(gates1, c2)

    # Head: h_n = concat([h_layer0, h_layer1]); linear1 as one matmul; linear2
    # has OUT == 1, so do it as a VPU multiply + lane reduce (no 1-lane MXU dot).
    hcat = jnp.concatenate([h1, h2], axis=1)                         # (B, 2H)
    l1 = jnp.dot(hcat, w1_ref[...],
                 preferred_element_type=jnp.float32) + bl1_ref[...]  # (B, H2)
    out_ref[...] = (jnp.sum(l1 * w2t_ref[...], axis=1, keepdims=True)
                    + bl2_ref[...])                                  # (B, OUT)


def lstm_forward(x_bt, params):
    """x_bt: (B, T, IN) batch-first like PyTorch. Returns (B, OUT)."""
    names = ("wih0", "b0", "whh0", "w10", "b1", "w1", "bl1", "w2t", "bl2")
    n_in = 1 + len(names)
    return pl.pallas_call(
        lstm_kernel,
        out_shape=jax.ShapeDtypeStruct((B, OUT), jnp.float32),
        # Single invocation (no grid): every operand is a whole-array VMEM block.
        in_specs=[pl.BlockSpec(memory_space=pltpu.MemorySpace.VMEM)] * n_in,
        out_specs=pl.BlockSpec(memory_space=pltpu.MemorySpace.VMEM),
    )(x_bt.astype(jnp.float32), *[params[k] for k in names])


# ----------------------------------------------------------------------------
# Parameter construction + pure-JAX reference (PyTorch gate order i, f, g, o).
# ----------------------------------------------------------------------------
_IFOG = (0, 1, 3, 2)   # reorder PyTorch (i, f, g, o) -> kernel lane order (i, f, o, g)


def init_params(key):
    """Deterministic synthetic init (uniform(-1/sqrt(H), 1/sqrt(H)) like torch),
    in a 'natural' per-gate layout used by the pure-JAX reference."""
    scale = 1.0 / jnp.sqrt(jnp.float32(H))
    shapes = {
        "Wih0": (4, IN, H),   # layer-0 input weights, per gate (i,f,g,o)
        "Whh0": (4, H, H),    # layer-0 recurrent weights
        "B0":   (4, H),       # layer-0 combined bias (b_ih + b_hh)
        "Wih1": (4, H, H),    # layer-1 input (= layer-0 hidden) weights
        "Whh1": (4, H, H),
        "B1":   (4, H),
        "W1":   (2 * H, H2),  # linear1 (acting on concat([h1, h2]))
        "Bl1":  (H2,),
        "W2":   (H2, OUT),    # linear2
        "Bl2":  (OUT,),
    }
    keys = jax.random.split(key, len(shapes))
    p = {}
    for k, (name, shp) in zip(keys, shapes.items()):
        p[name] = jax.random.uniform(k, shp, jnp.float32,
                                     minval=-scale, maxval=scale)
    return p


def pack_params(p):
    """Restack into the lane-dense, gate-fused layout the kernel consumes."""
    def stack_gates(w):   # (4, r, H) -> (r, 4H), lane order (i, f, o, g)
        return jnp.concatenate([w[k] for k in _IFOG], axis=-1)

    return {
        "wih0": stack_gates(p["Wih0"]),                        # (IN, 4H)
        "b0":   stack_gates(p["B0"][:, None, :]),              # (1, 4H)
        "whh0": stack_gates(p["Whh0"]),                        # (H, 4H)
        "w10":  jnp.concatenate([stack_gates(p["Wih1"]),
                                 stack_gates(p["Whh1"])], axis=0),  # (2H, 4H)
        "b1":   stack_gates(p["B1"][:, None, :]),              # (1, 4H)
        "w1":   p["W1"],                                       # (2H, H2)
        "bl1":  p["Bl1"][None, :],                             # (1, H2)
        "w2t":  p["W2"].T,                                     # (OUT, H2) = (1, H2)
        "bl2":  p["Bl2"][None, :],                             # (1, OUT)
    }


def reference(x_bt, p):
    """Pure-JAX reference of the same forward pass (PyTorch gate order)."""
    def cell(xt, h, c, wih, whh, b):
        gates = [xt @ wih[k] + h @ whh[k] + b[k] for k in range(4)]
        i = jax.nn.sigmoid(gates[0])
        f = jax.nn.sigmoid(gates[1])
        g = jnp.tanh(gates[2])
        o = jax.nn.sigmoid(gates[3])
        c_new = f * c + i * g
        return o * jnp.tanh(c_new), c_new

    h1 = jnp.zeros((B, H), jnp.float32)
    c1 = jnp.zeros((B, H), jnp.float32)
    h2 = jnp.zeros((B, H), jnp.float32)
    c2 = jnp.zeros((B, H), jnp.float32)
    for t in range(T):
        xt = x_bt[:, t, :]
        h1, c1 = cell(xt, h1, c1, p["Wih0"], p["Whh0"], p["B0"])
        h2, c2 = cell(h1, h2, c2, p["Wih1"], p["Whh1"], p["B1"])
    hcat = jnp.concatenate([h1, h2], axis=1)
    l1 = hcat @ p["W1"] + p["Bl1"]
    return l1 @ p["W2"] + p["Bl2"]


if __name__ == "__main__":
    key = jax.random.PRNGKey(0)
    pkey, xkey = jax.random.split(key)
    raw_params = init_params(pkey)
    packed = pack_params(raw_params)
    x = jax.random.normal(xkey, (B, T, IN), jnp.float32)  # batch-first like PyTorch

    out = lstm_forward(x, packed)
    out = jax.block_until_ready(out)

    ref = reference(x, raw_params)
    assert out.shape == (B, OUT), out.shape
    assert jnp.allclose(out, ref, atol=2e-5, rtol=2e-5), (out, ref)
    print("KERNEL_OK")
</pallas_src>

<mosaic_0001>
module attributes {stable_mosaic.version = 11 : i64} {
  func.func @lstm_kernel(%arg0: memref<4x8x1xf32, #tpu.memory_space<vmem>>, %arg1: memref<1x128xf32, #tpu.memory_space<vmem>>, %arg2: memref<1x128xf32, #tpu.memory_space<vmem>>, %arg3: memref<32x128xf32, #tpu.memory_space<vmem>>, %arg4: memref<64x128xf32, #tpu.memory_space<vmem>>, %arg5: memref<1x128xf32, #tpu.memory_space<vmem>>, %arg6: memref<64x16xf32, #tpu.memory_space<vmem>>, %arg7: memref<1x16xf32, #tpu.memory_space<vmem>>, %arg8: memref<1x16xf32, #tpu.memory_space<vmem>>, %arg9: memref<1x1xf32, #tpu.memory_space<vmem>>, %arg10: memref<4x1xf32, #tpu.memory_space<vmem>>) attributes {dimension_semantics = [], scalar_prefetch = 0 : i64, scratch_operands = 0 : i64, tpu.core_type = #tpu.core_type<tc>} {
    %c0 = arith.constant 0 : index
    %c0_0 = arith.constant 0 : index
    %c0_1 = arith.constant 0 : index
    %0 = vector.load %arg0[%c0, %c0_0, %c0_1] : memref<4x8x1xf32, #tpu.memory_space<vmem>>, vector<4x8x1xf32>
    %c0_2 = arith.constant 0 : index
    %c0_3 = arith.constant 0 : index
    %1 = vector.load %arg1[%c0_2, %c0_3] : memref<1x128xf32, #tpu.memory_space<vmem>>, vector<1x128xf32>
    %c0_4 = arith.constant 0 : index
    %c0_5 = arith.constant 0 : index
    %2 = vector.load %arg2[%c0_4, %c0_5] : memref<1x128xf32, #tpu.memory_space<vmem>>, vector<1x128xf32>
    %c0_6 = arith.constant 0 : index
    %c0_7 = arith.constant 0 : index
    %3 = vector.load %arg3[%c0_6, %c0_7] : memref<32x128xf32, #tpu.memory_space<vmem>>, vector<32x128xf32>
    %c0_8 = arith.constant 0 : index
    %c0_9 = arith.constant 0 : index
    %4 = vector.load %arg4[%c0_8, %c0_9] : memref<64x128xf32, #tpu.memory_space<vmem>>, vector<64x128xf32>
    %c0_10 = arith.constant 0 : index
    %c0_11 = arith.constant 0 : index
    %5 = vector.load %arg5[%c0_10, %c0_11] : memref<1x128xf32, #tpu.memory_space<vmem>>, vector<1x128xf32>
    %6 = vector.shape_cast %1 : vector<1x128xf32> to vector<1x1x128xf32>
    %7 = vector.broadcast %0 : vector<4x8x1xf32> to vector<4x8x128xf32>
    %8 = vector.broadcast %6 : vector<1x1x128xf32> to vector<4x8x128xf32>
    %9 = arith.mulf %7, %8 : vector<4x8x128xf32>
    %10 = vector.shape_cast %2 : vector<1x128xf32> to vector<1x1x128xf32>
    %11 = vector.broadcast %10 : vector<1x1x128xf32> to vector<4x8x128xf32>
    %12 = arith.addf %9, %11 : vector<4x8x128xf32>
    %13 = vector.shape_cast %5 : vector<1x128xf32> to vector<1x128xf32>
    %14 = vector.broadcast %13 : vector<1x128xf32> to vector<4x128xf32>
    %cst = arith.constant 0.000000e+00 : f32
    %15 = vector.broadcast %cst : f32 to vector<4x32xf32>
    %16 = vector.extract_strided_slice %12 {offsets = [0, 0, 0], sizes = [4, 1, 128], strides = [1, 1, 1]} : vector<4x8x128xf32> to vector<4x1x128xf32>
    %17 = vector.shape_cast %16 : vector<4x1x128xf32> to vector<4x128xf32>
    %cst_12 = arith.constant dense<0.000000e+00> : vector<4x128xf32>
    %18 = tpu.matmul %15, %3, %cst_12 {dimension_numbers = #tpu.dot_dimension_numbers<[1], [0], [0], [1], [0, 0, 1, 1], [], []>} : vector<4x32xf32>, vector<32x128xf32>, vector<4x128xf32> -> vector<4x128xf32>
    %19 = arith.addf %17, %18 : vector<4x128xf32>
    %20 = vector.extract_strided_slice %19 {offsets = [0, 0], sizes = [4, 96], strides = [1, 1]} : vector<4x128xf32> to vector<4x96xf32>
    %21 = arith.negf %20 : vector<4x96xf32>
    %22 = math.exp %21 : vector<4x96xf32>
    %cst_13 = arith.constant 1.000000e+00 : f32
    %23 = vector.broadcast %cst_13 : f32 to vector<4x96xf32>
    %24 = arith.addf %23, %22 : vector<4x96xf32>
    %25 = arith.divf %23, %24 : vector<4x96xf32>
    %26 = vector.extract_strided_slice %25 {offsets = [0, 0], sizes = [4, 32], strides = [1, 1]} : vector<4x96xf32> to vector<4x32xf32>
    %27 = vector.extract_strided_slice %25 {offsets = [0, 32], sizes = [4, 32], strides = [1, 1]} : vector<4x96xf32> to vector<4x32xf32>
    %28 = vector.extract_strided_slice %25 {offsets = [0, 64], sizes = [4, 32], strides = [1, 1]} : vector<4x96xf32> to vector<4x32xf32>
    %29 = vector.extract_strided_slice %19 {offsets = [0, 96], sizes = [4, 32], strides = [1, 1]} : vector<4x128xf32> to vector<4x32xf32>
    %30 = math.tanh %29 : vector<4x32xf32>
    %31 = arith.mulf %27, %15 : vector<4x32xf32>
    %32 = arith.mulf %26, %30 : vector<4x32xf32>
    %33 = arith.addf %31, %32 : vector<4x32xf32>
    %34 = math.tanh %33 : vector<4x32xf32>
    %35 = arith.mulf %28, %34 : vector<4x32xf32>
    %36 = tpu.concatenate %35, %15 in 1 : vector<4x32xf32>, vector<4x32xf32> -> vector<4x64xf32>
    %cst_14 = arith.constant dense<0.000000e+00> : vector<4x128xf32>
    %37 = tpu.matmul %36, %4, %cst_14 {dimension_numbers = #tpu.dot_dimension_numbers<[1], [0], [0], [1], [0, 0, 1, 1], [], []>} : vector<4x64xf32>, vector<64x128xf32>, vector<4x128xf32> -> vector<4x128xf32>
    %38 = arith.addf %37, %14 : vector<4x128xf32>
    %39 = vector.extract_strided_slice %38 {offsets = [0, 0], sizes = [4, 96], strides = [1, 1]} : vector<4x128xf32> to vector<4x96xf32>
    %40 = arith.negf %39 : vector<4x96xf32>
    %41 = math.exp %40 : vector<4x96xf32>
    %cst_15 = arith.constant 1.000000e+00 : f32
    %42 = vector.broadcast %cst_15 : f32 to vector<4x96xf32>
    %43 = arith.addf %42, %41 : vector<4x96xf32>
    %44 = arith.divf %42, %43 : vector<4x96xf32>
    %45 = vector.extract_strided_slice %44 {offsets = [0, 0], sizes = [4, 32], strides = [1, 1]} : vector<4x96xf32> to vector<4x32xf32>
    %46 = vector.extract_strided_slice %44 {offsets = [0, 32], sizes = [4, 32], strides = [1, 1]} : vector<4x96xf32> to vector<4x32xf32>
    %47 = vector.extract_strided_slice %44 {offsets = [0, 64], sizes = [4, 32], strides = [1, 1]} : vector<4x96xf32> to vector<4x32xf32>
    %48 = vector.extract_strided_slice %38 {offsets = [0, 96], sizes = [4, 32], strides = [1, 1]} : vector<4x128xf32> to vector<4x32xf32>
    %49 = math.tanh %48 : vector<4x32xf32>
    %50 = arith.mulf %46, %15 : vector<4x32xf32>
    %51 = arith.mulf %45, %49 : vector<4x32xf32>
    %52 = arith.addf %50, %51 : vector<4x32xf32>
    %53 = math.tanh %52 : vector<4x32xf32>
    %54 = arith.mulf %47, %53 : vector<4x32xf32>
    %55 = vector.extract_strided_slice %12 {offsets = [0, 1, 0], sizes = [4, 1, 128], strides = [1, 1, 1]} : vector<4x8x128xf32> to vector<4x1x128xf32>
    %56 = vector.shape_cast %55 : vector<4x1x128xf32> to vector<4x128xf32>
    %cst_16 = arith.constant dense<0.000000e+00> : vector<4x128xf32>
    %57 = tpu.matmul %35, %3, %cst_16 {dimension_numbers = #tpu.dot_dimension_numbers<[1], [0], [0], [1], [0, 0, 1, 1], [], []>} : vector<4x32xf32>, vector<32x128xf32>, vector<4x128xf32> -> vector<4x128xf32>
    %58 = arith.addf %56, %57 : vector<4x128xf32>
    %59 = vector.extract_strided_slice %58 {offsets = [0, 0], sizes = [4, 96], strides = [1, 1]} : vector<4x128xf32> to vector<4x96xf32>
    %60 = arith.negf %59 : vector<4x96xf32>
    %61 = math.exp %60 : vector<4x96xf32>
    %cst_17 = arith.constant 1.000000e+00 : f32
    %62 = vector.broadcast %cst_17 : f32 to vector<4x96xf32>
    %63 = arith.addf %62, %61 : vector<4x96xf32>
    %64 = arith.divf %62, %63 : vector<4x96xf32>
    %65 = vector.extract_strided_slice %64 {offsets = [0, 0], sizes = [4, 32], strides = [1, 1]} : vector<4x96xf32> to vector<4x32xf32>
    %66 = vector.extract_strided_slice %64 {offsets = [0, 32], sizes = [4, 32], strides = [1, 1]} : vector<4x96xf32> to vector<4x32xf32>
    %67 = vector.extract_strided_slice %64 {offsets = [0, 64], sizes = [4, 32], strides = [1, 1]} : vector<4x96xf32> to vector<4x32xf32>
    %68 = vector.extract_strided_slice %58 {offsets = [0, 96], sizes = [4, 32], strides = [1, 1]} : vector<4x128xf32> to vector<4x32xf32>
    %69 = math.tanh %68 : vector<4x32xf32>
    %70 = arith.mulf %66, %33 : vector<4x32xf32>
    %71 = arith.mulf %65, %69 : vector<4x32xf32>
    %72 = arith.addf %70, %71 : vector<4x32xf32>
    %73 = math.tanh %72 : vector<4x32xf32>
    %74 = arith.mulf %67, %73 : vector<4x32xf32>
    %75 = tpu.concatenate %74, %54 in 1 : vector<4x32xf32>, vector<4x32xf32> -> vector<4x64xf32>
    %cst_18 = arith.constant dense<0.000000e+00> : vector<4x128xf32>
    %76 = tpu.matmul %75, %4, %cst_18 {dimension_numbers = #tpu.dot_dimension_numbers<[1], [0], [0], [1], [0, 0, 1, 1], [], []>} : vector<4x64xf32>, vector<64x128xf32>, vector<4x128xf32> -> vector<4x128xf32>
    %77 = arith.addf %76, %14 : vector<4x128xf32>
    %78 = vector.extract_strided_slice %77 {offsets = [0, 0], sizes = [4, 96], strides = [1, 1]} : vector<4x128xf32> to vector<4x96xf32>
    %79 = arith.negf %78 : vector<4x96xf32>
    %80 = math.exp %79 : vector<4x96xf32>
    %cst_19 = arith.constant 1.000000e+00 : f32
    %81 = vector.broadcast %cst_19 : f32 to vector<4x96xf32>
    %82 = arith.addf %81, %80 : vector<4x96xf32>
    %83 = arith.divf %81, %82 : vector<4x96xf32>
    %84 = vector.extract_strided_slice %83 {offsets = [0, 0], sizes = [4, 32], strides = [1, 1]} : vector<4x96xf32> to vector<4x32xf32>
    %85 = vector.extract_strided_slice %83 {offsets = [0, 32], sizes = [4, 32], strides = [1, 1]} : vector<4x96xf32> to vector<4x32xf32>
    %86 = vector.extract_strided_slice %83 {offsets = [0, 64], sizes = [4, 32], strides = [1, 1]} : vector<4x96xf32> to vector<4x32xf32>
    %87 = vector.extract_strided_slice %77 {offsets = [0, 96], sizes = [4, 32], strides = [1, 1]} : vector<4x128xf32> to vector<4x32xf32>
    %88 = math.tanh %87 : vector<4x32xf32>
    %89 = arith.mulf %85, %52 : vector<4x32xf32>
    %90 = arith.mulf %84, %88 : vector<4x32xf32>
    %91 = arith.addf %89, %90 : vector<4x32xf32>
    %92 = math.tanh %91 : vector<4x32xf32>
    %93 = arith.mulf %86, %92 : vector<4x32xf32>
    %94 = vector.extract_strided_slice %12 {offsets = [0, 2, 0], sizes = [4, 1, 128], strides = [1, 1, 1]} : vector<4x8x128xf32> to vector<4x1x128xf32>
    %95 = vector.shape_cast %94 : vector<4x1x128xf32> to vector<4x128xf32>
    %cst_20 = arith.constant dense<0.000000e+00> : vector<4x128xf32>
    %96 = tpu.matmul %74, %3, %cst_20 {dimension_numbers = #tpu.dot_dimension_numbers<[1], [0], [0], [1], [0, 0, 1, 1], [], []>} : vector<4x32xf32>, vector<32x128xf32>, vector<4x128xf32> -> vector<4x128xf32>
    %97 = arith.addf %95, %96 : vector<4x128xf32>
    %98 = vector.extract_strided_slice %97 {offsets = [0, 0], sizes = [4, 96], strides = [1, 1]} : vector<4x128xf32> to vector<4x96xf32>
    %99 = arith.negf %98 : vector<4x96xf32>
    %100 = math.exp %99 : vector<4x96xf32>
    %cst_21 = arith.constant 1.000000e+00 : f32
    %101 = vector.broadcast %cst_21 : f32 to vector<4x96xf32>
    %102 = arith.addf %101, %100 : vector<4x96xf32>
    %103 = arith.divf %101, %102 : vector<4x96xf32>
    %104 = vector.extract_strided_slice %103 {offsets = [0, 0], sizes = [4, 32], strides = [1, 1]} : vector<4x96xf32> to vector<4x32xf32>
    %105 = vector.extract_strided_slice %103 {offsets = [0, 32], sizes = [4, 32], strides = [1, 1]} : vector<4x96xf32> to vector<4x32xf32>
    %106 = vector.extract_strided_slice %103 {offsets = [0, 64], sizes = [4, 32], strides = [1, 1]} : vector<4x96xf32> to vector<4x32xf32>
    %107 = vector.extract_strided_slice %97 {offsets = [0, 96], sizes = [4, 32], strides = [1, 1]} : vector<4x128xf32> to vector<4x32xf32>
    %108 = math.tanh %107 : vector<4x32xf32>
    %109 = arith.mulf %105, %72 : vector<4x32xf32>
    %110 = arith.mulf %104, %108 : vector<4x32xf32>
    %111 = arith.addf %109, %110 : vector<4x32xf32>
    %112 = math.tanh %111 : vector<4x32xf32>
    %113 = arith.mulf %106, %112 : vector<4x32xf32>
    %114 = tpu.concatenate %113, %93 in 1 : vector<4x32xf32>, vector<4x32xf32> -> vector<4x64xf32>
    %cst_22 = arith.constant dense<0.000000e+00> : vector<4x128xf32>
    %115 = tpu.matmul %114, %4, %cst_22 {dimension_numbers = #tpu.dot_dimension_numbers<[1], [0], [0], [1], [0, 0, 1, 1], [], []>} : vector<4x64xf32>, vector<64x128xf32>, vector<4x128xf32> -> vector<4x128xf32>
    %116 = arith.addf %115, %14 : vector<4x128xf32>
    %117 = vector.extract_strided_slice %116 {offsets = [0, 0], sizes = [4, 96], strides = [1, 1]} : vector<4x128xf32> to vector<4x96xf32>
    %118 = arith.negf %117 : vector<4x96xf32>
    %119 = math.exp %118 : vector<4x96xf32>
    %cst_23 = arith.constant 1.000000e+00 : f32
    %120 = vector.broadcast %cst_23 : f32 to vector<4x96xf32>
    %121 = arith.addf %120, %119 : vector<4x96xf32>
    %122 = arith.divf %120, %121 : vector<4x96xf32>
    %123 = vector.extract_strided_slice %122 {offsets = [0, 0], sizes = [4, 32], strides = [1, 1]} : vector<4x96xf32> to vector<4x32xf32>
    %124 = vector.extract_strided_slice %122 {offsets = [0, 32], sizes = [4, 32], strides = [1, 1]} : vector<4x96xf32> to vector<4x32xf32>
    %125 = vector.extract_strided_slice %122 {offsets = [0, 64], sizes = [4, 32], strides = [1, 1]} : vector<4x96xf32> to vector<4x32xf32>
    %126 = vector.extract_strided_slice %116 {offsets = [0, 96], sizes = [4, 32], strides = [1, 1]} : vector<4x128xf32> to vector<4x32xf32>
    %127 = math.tanh %126 : vector<4x32xf32>
    %128 = arith.mulf %124, %91 : vector<4x32xf32>
    %129 = arith.mulf %123, %127 : vector<4x32xf32>
    %130 = arith.addf %128, %129 : vector<4x32xf32>
    %131 = math.tanh %130 : vector<4x32xf32>
    %132 = arith.mulf %125, %131 : vector<4x32xf32>
    %133 = vector.extract_strided_slice %12 {offsets = [0, 3, 0], sizes = [4, 1, 128], strides = [1, 1, 1]} : vector<4x8x128xf32> to vector<4x1x128xf32>
    %134 = vector.shape_cast %133 : vector<4x1x128xf32> to vector<4x128xf32>
    %cst_24 = arith.constant dense<0.000000e+00> : vector<4x128xf32>
    %135 = tpu.matmul %113, %3, %cst_24 {dimension_numbers = #tpu.dot_dimension_numbers<[1], [0], [0], [1], [0, 0, 1, 1], [], []>} : vector<4x32xf32>, vector<32x128xf32>, vector<4x128xf32> -> vector<4x128xf32>
    %136 = arith.addf %134, %135 : vector<4x128xf32>
    %137 = vector.extract_strided_slice %136 {offsets = [0, 0], sizes = [4, 96], strides = [1, 1]} : vector<4x128xf32> to vector<4x96xf32>
    %138 = arith.negf %137 : vector<4x96xf32>
    %139 = math.exp %138 : vector<4x96xf32>
    %cst_25 = arith.constant 1.000000e+00 : f32
    %140 = vector.broadcast %cst_25 : f32 to vector<4x96xf32>
    %141 = arith.addf %140, %139 : vector<4x96xf32>
    %142 = arith.divf %140, %141 : vector<4x96xf32>
    %143 = vector.extract_strided_slice %142 {offsets = [0, 0], sizes = [4, 32], strides = [1, 1]} : vector<4x96xf32> to vector<4x32xf32>
    %144 = vector.extract_strided_slice %142 {offsets = [0, 32], sizes = [4, 32], strides = [1, 1]} : vector<4x96xf32> to vector<4x32xf32>
    %145 = vector.extract_strided_slice %142 {offsets = [0, 64], sizes = [4, 32], strides = [1, 1]} : vector<4x96xf32> to vector<4x32xf32>
    %146 = vector.extract_strided_slice %136 {offsets = [0, 96], sizes = [4, 32], strides = [1, 1]} : vector<4x128xf32> to vector<4x32xf32>
    %147 = math.tanh %146 : vector<4x32xf32>
    %148 = arith.mulf %144, %111 : vector<4x32xf32>
    %149 = arith.mulf %143, %147 : vector<4x32xf32>
    %150 = arith.addf %148, %149 : vector<4x32xf32>
    %151 = math.tanh %150 : vector<4x32xf32>
    %152 = arith.mulf %145, %151 : vector<4x32xf32>
    %153 = tpu.concatenate %152, %132 in 1 : vector<4x32xf32>, vector<4x32xf32> -> vector<4x64xf32>
    %cst_26 = arith.constant dense<0.000000e+00> : vector<4x128xf32>
    %154 = tpu.matmul %153, %4, %cst_26 {dimension_numbers = #tpu.dot_dimension_numbers<[1], [0], [0], [1], [0, 0, 1, 1], [], []>} : vector<4x64xf32>, vector<64x128xf32>, vector<4x128xf32> -> vector<4x128xf32>
    %155 = arith.addf %154, %14 : vector<4x128xf32>
    %156 = vector.extract_strided_slice %155 {offsets = [0, 0], sizes = [4, 96], strides = [1, 1]} : vector<4x128xf32> to vector<4x96xf32>
    %157 = arith.negf %156 : vector<4x96xf32>
    %158 = math.exp %157 : vector<4x96xf32>
    %cst_27 = arith.constant 1.000000e+00 : f32
    %159 = vector.broadcast %cst_27 : f32 to vector<4x96xf32>
    %160 = arith.addf %159, %158 : vector<4x96xf32>
    %161 = arith.divf %159, %160 : vector<4x96xf32>
    %162 = vector.extract_strided_slice %161 {offsets = [0, 0], sizes = [4, 32], strides = [1, 1]} : vector<4x96xf32> to vector<4x32xf32>
    %163 = vector.extract_strided_slice %161 {offsets = [0, 32], sizes = [4, 32], strides = [1, 1]} : vector<4x96xf32> to vector<4x32xf32>
    %164 = vector.extract_strided_slice %161 {offsets = [0, 64], sizes = [4, 32], strides = [1, 1]} : vector<4x96xf32> to vector<4x32xf32>
    %165 = vector.extract_strided_slice %155 {offsets = [0, 96], sizes = [4, 32], strides = [1, 1]} : vector<4x128xf32> to vector<4x32xf32>
    %166 = math.tanh %165 : vector<4x32xf32>
    %167 = arith.mulf %163, %130 : vector<4x32xf32>
    %168 = arith.mulf %162, %166 : vector<4x32xf32>
    %169 = arith.addf %167, %168 : vector<4x32xf32>
    %170 = math.tanh %169 : vector<4x32xf32>
    %171 = arith.mulf %164, %170 : vector<4x32xf32>
    %172 = vector.extract_strided_slice %12 {offsets = [0, 4, 0], sizes = [4, 1, 128], strides = [1, 1, 1]} : vector<4x8x128xf32> to vector<4x1x128xf32>
    %173 = vector.shape_cast %172 : vector<4x1x128xf32> to vector<4x128xf32>
    %cst_28 = arith.constant dense<0.000000e+00> : vector<4x128xf32>
    %174 = tpu.matmul %152, %3, %cst_28 {dimension_numbers = #tpu.dot_dimension_numbers<[1], [0], [0], [1], [0, 0, 1, 1], [], []>} : vector<4x32xf32>, vector<32x128xf32>, vector<4x128xf32> -> vector<4x128xf32>
    %175 = arith.addf %173, %174 : vector<4x128xf32>
    %176 = vector.extract_strided_slice %175 {offsets = [0, 0], sizes = [4, 96], strides = [1, 1]} : vector<4x128xf32> to vector<4x96xf32>
    %177 = arith.negf %176 : vector<4x96xf32>
    %178 = math.exp %177 : vector<4x96xf32>
    %cst_29 = arith.constant 1.000000e+00 : f32
    %179 = vector.broadcast %cst_29 : f32 to vector<4x96xf32>
    %180 = arith.addf %179, %178 : vector<4x96xf32>
    %181 = arith.divf %179, %180 : vector<4x96xf32>
    %182 = vector.extract_strided_slice %181 {offsets = [0, 0], sizes = [4, 32], strides = [1, 1]} : vector<4x96xf32> to vector<4x32xf32>
    %183 = vector.extract_strided_slice %181 {offsets = [0, 32], sizes = [4, 32], strides = [1, 1]} : vector<4x96xf32> to vector<4x32xf32>
    %184 = vector.extract_strided_slice %181 {offsets = [0, 64], sizes = [4, 32], strides = [1, 1]} : vector<4x96xf32> to vector<4x32xf32>
    %185 = vector.extract_strided_slice %175 {offsets = [0, 96], sizes = [4, 32], strides = [1, 1]} : vector<4x128xf32> to vector<4x32xf32>
    %186 = math.tanh %185 : vector<4x32xf32>
    %187 = arith.mulf %183, %150 : vector<4x32xf32>
    %188 = arith.mulf %182, %186 : vector<4x32xf32>
    %189 = arith.addf %187, %188 : vector<4x32xf32>
    %190 = math.tanh %189 : vector<4x32xf32>
    %191 = arith.mulf %184, %190 : vector<4x32xf32>
    %192 = tpu.concatenate %191, %171 in 1 : vector<4x32xf32>, vector<4x32xf32> -> vector<4x64xf32>
    %cst_30 = arith.constant dense<0.000000e+00> : vector<4x128xf32>
    %193 = tpu.matmul %192, %4, %cst_30 {dimension_numbers = #tpu.dot_dimension_numbers<[1], [0], [0], [1], [0, 0, 1, 1], [], []>} : vector<4x64xf32>, vector<64x128xf32>, vector<4x128xf32> -> vector<4x128xf32>
    %194 = arith.addf %193, %14 : vector<4x128xf32>
    %195 = vector.extract_strided_slice %194 {offsets = [0, 0], sizes = [4, 96], strides = [1, 1]} : vector<4x128xf32> to vector<4x96xf32>
    %196 = arith.negf %195 : vector<4x96xf32>
    %197 = math.exp %196 : vector<4x96xf32>
    %cst_31 = arith.constant 1.000000e+00 : f32
    %198 = vector.broadcast %cst_31 : f32 to vector<4x96xf32>
    %199 = arith.addf %198, %197 : vector<4x96xf32>
    %200 = arith.divf %198, %199 : vector<4x96xf32>
    %201 = vector.extract_strided_slice %200 {offsets = [0, 0], sizes = [4, 32], strides = [1, 1]} : vector<4x96xf32> to vector<4x32xf32>
    %202 = vector.extract_strided_slice %200 {offsets = [0, 32], sizes = [4, 32], strides = [1, 1]} : vector<4x96xf32> to vector<4x32xf32>
    %203 = vector.extract_strided_slice %200 {offsets = [0, 64], sizes = [4, 32], strides = [1, 1]} : vector<4x96xf32> to vector<4x32xf32>
    %204 = vector.extract_strided_slice %194 {offsets = [0, 96], sizes = [4, 32], strides = [1, 1]} : vector<4x128xf32> to vector<4x32xf32>
    %205 = math.tanh %204 : vector<4x32xf32>
    %206 = arith.mulf %202, %169 : vector<4x32xf32>
    %207 = arith.mulf %201, %205 : vector<4x32xf32>
    %208 = arith.addf %206, %207 : vector<4x32xf32>
    %209 = math.tanh %208 : vector<4x32xf32>
    %210 = arith.mulf %203, %209 : vector<4x32xf32>
    %211 = vector.extract_strided_slice %12 {offsets = [0, 5, 0], sizes = [4, 1, 128], strides = [1, 1, 1]} : vector<4x8x128xf32> to vector<4x1x128xf32>
    %212 = vector.shape_cast %211 : vector<4x1x128xf32> to vector<4x128xf32>
    %cst_32 = arith.constant dense<0.000000e+00> : vector<4x128xf32>
    %213 = tpu.matmul %191, %3, %cst_32 {dimension_numbers = #tpu.dot_dimension_numbers<[1], [0], [0], [1], [0, 0, 1, 1], [], []>} : vector<4x32xf32>, vector<32x128xf32>, vector<4x128xf32> -> vector<4x128xf32>
    %214 = arith.addf %212, %213 : vector<4x128xf32>
    %215 = vector.extract_strided_slice %214 {offsets = [0, 0], sizes = [4, 96], strides = [1, 1]} : vector<4x128xf32> to vector<4x96xf32>
    %216 = arith.negf %215 : vector<4x96xf32>
    %217 = math.exp %216 : vector<4x96xf32>
    %cst_33 = arith.constant 1.000000e+00 : f32
    %218 = vector.broadcast %cst_33 : f32 to vector<4x96xf32>
    %219 = arith.addf %218, %217 : vector<4x96xf32>
    %220 = arith.divf %218, %219 : vector<4x96xf32>
    %221 = vector.extract_strided_slice %220 {offsets = [0, 0], sizes = [4, 32], strides = [1, 1]} : vector<4x96xf32> to vector<4x32xf32>
    %222 = vector.extract_strided_slice %220 {offsets = [0, 32], sizes = [4, 32], strides = [1, 1]} : vector<4x96xf32> to vector<4x32xf32>
    %223 = vector.extract_strided_slice %220 {offsets = [0, 64], sizes = [4, 32], strides = [1, 1]} : vector<4x96xf32> to vector<4x32xf32>
    %224 = vector.extract_strided_slice %214 {offsets = [0, 96], sizes = [4, 32], strides = [1, 1]} : vector<4x128xf32> to vector<4x32xf32>
    %225 = math.tanh %224 : vector<4x32xf32>
    %226 = arith.mulf %222, %189 : vector<4x32xf32>
    %227 = arith.mulf %221, %225 : vector<4x32xf32>
    %228 = arith.addf %226, %227 : vector<4x32xf32>
    %229 = math.tanh %228 : vector<4x32xf32>
    %230 = arith.mulf %223, %229 : vector<4x32xf32>
    %231 = tpu.concatenate %230, %210 in 1 : vector<4x32xf32>, vector<4x32xf32> -> vector<4x64xf32>
    %cst_34 = arith.constant dense<0.000000e+00> : vector<4x128xf32>
    %232 = tpu.matmul %231, %4, %cst_34 {dimension_numbers = #tpu.dot_dimension_numbers<[1], [0], [0], [1], [0, 0, 1, 1], [], []>} : vector<4x64xf32>, vector<64x128xf32>, vector<4x128xf32> -> vector<4x128xf32>
    %233 = arith.addf %232, %14 : vector<4x128xf32>
    %234 = vector.extract_strided_slice %233 {offsets = [0, 0], sizes = [4, 96], strides = [1, 1]} : vector<4x128xf32> to vector<4x96xf32>
    %235 = arith.negf %234 : vector<4x96xf32>
    %236 = math.exp %235 : vector<4x96xf32>
    %cst_35 = arith.constant 1.000000e+00 : f32
    %237 = vector.broadcast %cst_35 : f32 to vector<4x96xf32>
    %238 = arith.addf %237, %236 : vector<4x96xf32>
    %239 = arith.divf %237, %238 : vector<4x96xf32>
    %240 = vector.extract_strided_slice %239 {offsets = [0, 0], sizes = [4, 32], strides = [1, 1]} : vector<4x96xf32> to vector<4x32xf32>
    %241 = vector.extract_strided_slice %239 {offsets = [0, 32], sizes = [4, 32], strides = [1, 1]} : vector<4x96xf32> to vector<4x32xf32>
    %242 = vector.extract_strided_slice %239 {offsets = [0, 64], sizes = [4, 32], strides = [1, 1]} : vector<4x96xf32> to vector<4x32xf32>
    %243 = vector.extract_strided_slice %233 {offsets = [0, 96], sizes = [4, 32], strides = [1, 1]} : vector<4x128xf32> to vector<4x32xf32>
    %244 = math.tanh %243 : vector<4x32xf32>
    %245 = arith.mulf %241, %208 : vector<4x32xf32>
    %246 = arith.mulf %240, %244 : vector<4x32xf32>
    %247 = arith.addf %245, %246 : vector<4x32xf32>
    %248 = math.tanh %247 : vector<4x32xf32>
    %249 = arith.mulf %242, %248 : vector<4x32xf32>
    %250 = vector.extract_strided_slice %12 {offsets = [0, 6, 0], sizes = [4, 1, 128], strides = [1, 1, 1]} : vector<4x8x128xf32> to vector<4x1x128xf32>
    %251 = vector.shape_cast %250 : vector<4x1x128xf32> to vector<4x128xf32>
    %cst_36 = arith.constant dense<0.000000e+00> : vector<4x128xf32>
    %252 = tpu.matmul %230, %3, %cst_36 {dimension_numbers = #tpu.dot_dimension_numbers<[1], [0], [0], [1], [0, 0, 1, 1], [], []>} : vector<4x32xf32>, vector<32x128xf32>, vector<4x128xf32> -> vector<4x128xf32>
    %253 = arith.addf %251, %252 : vector<4x128xf32>
    %254 = vector.extract_strided_slice %253 {offsets = [0, 0], sizes = [4, 96], strides = [1, 1]} : vector<4x128xf32> to vector<4x96xf32>
    %255 = arith.negf %254 : vector<4x96xf32>
    %256 = math.exp %255 : vector<4x96xf32>
    %cst_37 = arith.constant 1.000000e+00 : f32
    %257 = vector.broadcast %cst_37 : f32 to vector<4x96xf32>
    %258 = arith.addf %257, %256 : vector<4x96xf32>
    %259 = arith.divf %257, %258 : vector<4x96xf32>
    %260 = vector.extract_strided_slice %259 {offsets = [0, 0], sizes = [4, 32], strides = [1, 1]} : vector<4x96xf32> to vector<4x32xf32>
    %261 = vector.extract_strided_slice %259 {offsets = [0, 32], sizes = [4, 32], strides = [1, 1]} : vector<4x96xf32> to vector<4x32xf32>
    %262 = vector.extract_strided_slice %259 {offsets = [0, 64], sizes = [4, 32], strides = [1, 1]} : vector<4x96xf32> to vector<4x32xf32>
    %263 = vector.extract_strided_slice %253 {offsets = [0, 96], sizes = [4, 32], strides = [1, 1]} : vector<4x128xf32> to vector<4x32xf32>
    %264 = math.tanh %263 : vector<4x32xf32>
    %265 = arith.mulf %261, %228 : vector<4x32xf32>
    %266 = arith.mulf %260, %264 : vector<4x32xf32>
    %267 = arith.addf %265, %266 : vector<4x32xf32>
    %268 = math.tanh %267 : vector<4x32xf32>
    %269 = arith.mulf %262, %268 : vector<4x32xf32>
    %270 = tpu.concatenate %269, %249 in 1 : vector<4x32xf32>, vector<4x32xf32> -> vector<4x64xf32>
    %cst_38 = arith.constant dense<0.000000e+00> : vector<4x128xf32>
    %271 = tpu.matmul %270, %4, %cst_38 {dimension_numbers = #tpu.dot_dimension_numbers<[1], [0], [0], [1], [0, 0, 1, 1], [], []>} : vector<4x64xf32>, vector<64x128xf32>, vector<4x128xf32> -> vector<4x128xf32>
    %272 = arith.addf %271, %14 : vector<4x128xf32>
    %273 = vector.extract_strided_slice %272 {offsets = [0, 0], sizes = [4, 96], strides = [1, 1]} : vector<4x128xf32> to vector<4x96xf32>
    %274 = arith.negf %273 : vector<4x96xf32>
    %275 = math.exp %274 : vector<4x96xf32>
    %cst_39 = arith.constant 1.000000e+00 : f32
    %276 = vector.broadcast %cst_39 : f32 to vector<4x96xf32>
    %277 = arith.addf %276, %275 : vector<4x96xf32>
    %278 = arith.divf %276, %277 : vector<4x96xf32>
    %279 = vector.extract_strided_slice %278 {offsets = [0, 0], sizes = [4, 32], strides = [1, 1]} : vector<4x96xf32> to vector<4x32xf32>
    %280 = vector.extract_strided_slice %278 {offsets = [0, 32], sizes = [4, 32], strides = [1, 1]} : vector<4x96xf32> to vector<4x32xf32>
    %281 = vector.extract_strided_slice %278 {offsets = [0, 64], sizes = [4, 32], strides = [1, 1]} : vector<4x96xf32> to vector<4x32xf32>
    %282 = vector.extract_strided_slice %272 {offsets = [0, 96], sizes = [4, 32], strides = [1, 1]} : vector<4x128xf32> to vector<4x32xf32>
    %283 = math.tanh %282 : vector<4x32xf32>
    %284 = arith.mulf %280, %247 : vector<4x32xf32>
    %285 = arith.mulf %279, %283 : vector<4x32xf32>
    %286 = arith.addf %284, %285 : vector<4x32xf32>
    %287 = math.tanh %286 : vector<4x32xf32>
    %288 = arith.mulf %281, %287 : vector<4x32xf32>
    %289 = vector.extract_strided_slice %12 {offsets = [0, 7, 0], sizes = [4, 1, 128], strides = [1, 1, 1]} : vector<4x8x128xf32> to vector<4x1x128xf32>
    %290 = vector.shape_cast %289 : vector<4x1x128xf32> to vector<4x128xf32>
    %cst_40 = arith.constant dense<0.000000e+00> : vector<4x128xf32>
    %291 = tpu.matmul %269, %3, %cst_40 {dimension_numbers = #tpu.dot_dimension_numbers<[1], [0], [0], [1], [0, 0, 1, 1], [], []>} : vector<4x32xf32>, vector<32x128xf32>, vector<4x128xf32> -> vector<4x128xf32>
    %292 = arith.addf %290, %291 : vector<4x128xf32>
    %293 = vector.extract_strided_slice %292 {offsets = [0, 0], sizes = [4, 96], strides = [1, 1]} : vector<4x128xf32> to vector<4x96xf32>
    %294 = arith.negf %293 : vector<4x96xf32>
    %295 = math.exp %294 : vector<4x96xf32>
    %cst_41 = arith.constant 1.000000e+00 : f32
    %296 = vector.broadcast %cst_41 : f32 to vector<4x96xf32>
    %297 = arith.addf %296, %295 : vector<4x96xf32>
    %298 = arith.divf %296, %297 : vector<4x96xf32>
    %299 = vector.extract_strided_slice %298 {offsets = [0, 0], sizes = [4, 32], strides = [1, 1]} : vector<4x96xf32> to vector<4x32xf32>
    %300 = vector.extract_strided_slice %298 {offsets = [0, 32], sizes = [4, 32], strides = [1, 1]} : vector<4x96xf32> to vector<4x32xf32>
    %301 = vector.extract_strided_slice %298 {offsets = [0, 64], sizes = [4, 32], strides = [1, 1]} : vector<4x96xf32> to vector<4x32xf32>
    %302 = vector.extract_strided_slice %292 {offsets = [0, 96], sizes = [4, 32], strides = [1, 1]} : vector<4x128xf32> to vector<4x32xf32>
    %303 = math.tanh %302 : vector<4x32xf32>
    %304 = arith.mulf %300, %267 : vector<4x32xf32>
    %305 = arith.mulf %299, %303 : vector<4x32xf32>
    %306 = arith.addf %304, %305 : vector<4x32xf32>
    %307 = math.tanh %306 : vector<4x32xf32>
    %308 = arith.mulf %301, %307 : vector<4x32xf32>
    %309 = tpu.concatenate %308, %288 in 1 : vector<4x32xf32>, vector<4x32xf32> -> vector<4x64xf32>
    %cst_42 = arith.constant dense<0.000000e+00> : vector<4x128xf32>
    %310 = tpu.matmul %309, %4, %cst_42 {dimension_numbers = #tpu.dot_dimension_numbers<[1], [0], [0], [1], [0, 0, 1, 1], [], []>} : vector<4x64xf32>, vector<64x128xf32>, vector<4x128xf32> -> vector<4x128xf32>
    %311 = arith.addf %310, %14 : vector<4x128xf32>
    %312 = vector.extract_strided_slice %311 {offsets = [0, 0], sizes = [4, 96], strides = [1, 1]} : vector<4x128xf32> to vector<4x96xf32>
    %313 = arith.negf %312 : vector<4x96xf32>
    %314 = math.exp %313 : vector<4x96xf32>
    %cst_43 = arith.constant 1.000000e+00 : f32
    %315 = vector.broadcast %cst_43 : f32 to vector<4x96xf32>
    %316 = arith.addf %315, %314 : vector<4x96xf32>
    %317 = arith.divf %315, %316 : vector<4x96xf32>
    %318 = vector.extract_strided_slice %317 {offsets = [0, 0], sizes = [4, 32], strides = [1, 1]} : vector<4x96xf32> to vector<4x32xf32>
    %319 = vector.extract_strided_slice %317 {offsets = [0, 32], sizes = [4, 32], strides = [1, 1]} : vector<4x96xf32> to vector<4x32xf32>
    %320 = vector.extract_strided_slice %317 {offsets = [0, 64], sizes = [4, 32], strides = [1, 1]} : vector<4x96xf32> to vector<4x32xf32>
    %321 = vector.extract_strided_slice %311 {offsets = [0, 96], sizes = [4, 32], strides = [1, 1]} : vector<4x128xf32> to vector<4x32xf32>
    %322 = math.tanh %321 : vector<4x32xf32>
    %323 = arith.mulf %319, %286 : vector<4x32xf32>
    %324 = arith.mulf %318, %322 : vector<4x32xf32>
    %325 = arith.addf %323, %324 : vector<4x32xf32>
    %326 = math.tanh %325 : vector<4x32xf32>
    %327 = arith.mulf %320, %326 : vector<4x32xf32>
    %328 = tpu.concatenate %308, %327 in 1 : vector<4x32xf32>, vector<4x32xf32> -> vector<4x64xf32>
    %c0_44 = arith.constant 0 : index
    %c0_45 = arith.constant 0 : index
    %329 = vector.load %arg6[%c0_44, %c0_45] : memref<64x16xf32, #tpu.memory_space<vmem>>, vector<64x16xf32>
    %cst_46 = arith.constant dense<0.000000e+00> : vector<4x16xf32>
    %330 = tpu.matmul %328, %329, %cst_46 {dimension_numbers = #tpu.dot_dimension_numbers<[1], [0], [0], [1], [0, 0, 1, 1], [], []>} : vector<4x64xf32>, vector<64x16xf32>, vector<4x16xf32> -> vector<4x16xf32>
    %c0_47 = arith.constant 0 : index
    %c0_48 = arith.constant 0 : index
    %331 = vector.load %arg7[%c0_47, %c0_48] : memref<1x16xf32, #tpu.memory_space<vmem>>, vector<1x16xf32>
    %332 = vector.broadcast %331 : vector<1x16xf32> to vector<4x16xf32>
    %333 = arith.addf %330, %332 : vector<4x16xf32>
    %c0_49 = arith.constant 0 : index
    %c0_50 = arith.constant 0 : index
    %334 = vector.load %arg8[%c0_49, %c0_50] : memref<1x16xf32, #tpu.memory_space<vmem>>, vector<1x16xf32>
    %335 = vector.broadcast %334 : vector<1x16xf32> to vector<4x16xf32>
    %336 = arith.mulf %333, %335 : vector<4x16xf32>
    %cst_51 = arith.constant dense<0.000000e+00> : vector<4xf32>
    %337 = vector.multi_reduction <add>, %336, %cst_51 [1] : vector<4x16xf32> to vector<4xf32>
    %338 = vector.shape_cast %337 : vector<4xf32> to vector<4x1xf32>
    %c0_52 = arith.constant 0 : index
    %c0_53 = arith.constant 0 : index
    %339 = vector.load %arg9[%c0_52, %c0_53] : memref<1x1xf32, #tpu.memory_space<vmem>>, vector<1x1xf32>
    %340 = vector.broadcast %339 : vector<1x1xf32> to vector<4x1xf32>
    %341 = arith.addf %338, %340 : vector<4x1xf32>
    %c0_54 = arith.constant 0 : index
    %c0_55 = arith.constant 0 : index
    %342 = vector.load %arg10[%c0_54, %c0_55] : memref<4x1xf32, #tpu.memory_space<vmem>>, vector<4x1xf32>
    tpu.vector_store %arg10[%c0_54, %c0_55], %341 {strides = array<i32>} : memref<4x1xf32, #tpu.memory_space<vmem>>, vector<4x1xf32>,
    return
  }
}

</mosaic_0001>

<bundles_post_ra>
// kernel: tpu_custom_call.1
= control target key start
LH: loop header
LB: loop body
LE: loop exit
PB: predicated region body
PF: predicated region fallthrough
CT: control target
= control target key end

     0   :  { %v3695_v0 = vmov 0.0|0.0   ;;  %vm3696_vm0 = vmmov 0   ;;  %v3697_v4 = vmov 0.0   ;;  %v3698_v7 = vmov 0   ;;  %s3701_s27 = smov 96   ;;  %s4408_s3 = inlined_call_operand.vmem [shape: f32[32,128], index: 3, kind: input, shape index: {}]   ;;  %s4409_s0 = inlined_call_operand.vmem [shape: f32[4,8,1], index: 0, kind: input, shape index: {}]   ;;  %s4410_s1 = inlined_call_operand.vmem [shape: f32[1,128], index: 1, kind: input, shape index: {}]   ;;  %s4411_s2 = inlined_call_operand.vmem [shape: f32[1,128], index: 2, kind: input, shape index: {}]   ;;  %s4412_s4 = inlined_call_operand.vmem [shape: f32[64,128], index: 4, kind: input, shape index: {}]   ;;  %s4413_s5 = inlined_call_operand.vmem [shape: f32[1,128], index: 5, kind: input, shape index: {}]   ;;  %s4414_s6 = inlined_call_operand.vmem [shape: f32[64,16], index: 6, kind: input, shape index: {}]   ;;  %s4415_s9 = inlined_call_operand.<no memory space> [shape: f32[1,1], index: 9, kind: input, shape index: {}]   ;;  %s4416_s7 = inlined_call_operand.vmem [shape: f32[1,16], index: 7, kind: input, shape index: {}]   ;;  %s4417_s8 = inlined_call_operand.vmem [shape: f32[1,16], index: 8, kind: input, shape index: {}]   ;;  %s4418_s10 = inlined_call_operand.vmem [shape: f32[4,1], index: 10, kind: output, shape index: {}]  }
   0x1   :  { %3209 = vmatprep.subr.bf16.mxu0 %v3695_v0  ;;  %v43_v1 = vld [vmem:[%s4408_s3] sm:$0xff]  ;;  %v44_v2 = vld [vmem:[%s4408_s3 + $0x8] sm:$0xff]  ;;  %v45_v3 = vld [vmem:[%s4408_s3 + $0x10] sm:$0xff]  ;;  %2958 = vmatprep.mubr.msk.f32.mxu0 %vm3696_vm0, %v3697_v4  ;;  %vm289_vm1 = vcmask 1041409   ;;  %vm292_vm2 = vcmask 1042434   ;;  %vm295_vm3 = vcmask 1043459  }
   0x2   :  { %v3769_v5 = vpack.c.bf16 %v44_v2, %v43_v1  ;;  %v46_v6 = vld [vmem:[%s4408_s3 + $0x18] sm:$0xff]  ;;  %3372 = vset.pattern.permute.xlu0 %v3698_v7  ;;  %v38_v8 = vld [vmem:[%s4409_s0 + $0x8] sm:$0xff]  ;;  %3373 = vset.pattern.permute.xlu1 %v3698_v7  ;;  %v37_v9 = vld [vmem:[%s4409_s0] sm:$0xff]  ;;  %vm102_vm4 = vcmask 261120   ;;  %vm301_vm5 = vcmask 523264   ;;  %vm600_vm6 = vcmask 1044484  }
   0x3   :  { %63 = vperm.xlu0 %3372, %v38_v8   ;;  %3215 = vmatprep.subr.bf16.mxu1 %v3695_v0  ;;  %v3782_v10 = vpack.c.bf16 %v46_v6, %v45_v3  ;;  %v39_v11 = vld [vmem:[%s4409_s0 + $0x10] sm:$0xff]  ;;  %v40_v12 = vld [vmem:[%s4409_s0 + $0x18] sm:$0xff]  ;;  %v2767_v15 = vld [vmem:[%s4410_s1] ss:$0 sm:$0xff]  ;;  %s3699_s1 = smov 32   ;;  %vm918_vm7 = vcmask 1045509  }
   0x4   :  { %3211 = vmatpush3.bf16.msra.mxu0 %v3769_v5  ;;  %58 = vperm.xlu1 %3373, %v37_v9   ;;  %v2768_v19 = vld [vmem:[%s4411_s2] ss:$0 sm:$0xff]  ;;  %vm1236_vm8 = vcmask 1046534   ;;  %vm1555_vm9 = vcmask 1047559   ;;  %vm1890_vm10 = vcmask 1042432   ;;  %vm2216_vm11 = vcmask 1041408  }
   0x5   :  { %3212 = vmatprep.subr.bf16.mxu0 %v3695_v0  ;;  %2977 = vmatprep.mubr.msk.f32.mxu1 %vm3696_vm0, %v3697_v4  ;;  %vm2542_vm12 = vcmask 1040384   ;;  %vm2749_vm13 = vcmask 125952   ;;  %vm2761_vm14 = vcmask 3072  }
   0x7   :  { %68 = vperm.xlu0 %3372, %v39_v11  }
   0x8   :  { %3214 = vmatpush3.bf16.msra.mxu0 %v3782_v10  ;;  %73 = vperm.xlu1 %3373, %v40_v12  }
   0x9   :  { %3227 = vmatprep.subr.bf16.mxu0 %v3695_v0 }
   0xb   :  { %2959 = vmatmul.mubr.f32.vlgmr.msra.gmra.mrb[0].mxu0 %v3697_v4 }
   0xc   :  { %3229 = vmatpush3.bf16.msra.mxu0 %v3769_v5  ;;  %2988 = vmatprep.mubr.msk.f32.mxu0 %vm3696_vm0, %v3697_v4 }
   0xd   :  { %3230 = vmatprep.subr.bf16.mxu0 %v3695_v0 }
  0x10   :  { %3232 = vmatpush3.bf16.msra.mxu0 %v3782_v10 }
  0x11   :  { %3233 = vmatprep.subr.bf16.mxu0 %v3695_v0 }
  0x82   :  { %v64_v13 = vpop.permute.xlu0 %63 }
  0x83   :  { %v59_v14 = vpop.permute.xlu1 %58  ;;  %v83_v16 = vmul.f32 %v2767_v15, %v64_v13 }
  0x84   :  { %v82_v18 = vmul.f32 %v2767_v15, %v59_v14 }
  0x85   :  { %v3808_v23 = vadd.f32 %v2768_v19, %v83_v16 }
  0x86   :  { %v69_v17 = vpop.permute.xlu0 %68  ;;  %v3810_v24 = vadd.f32 %v2768_v19, %v82_v18  ;;  %v48_v18 = vld [vmem:[%s4412_s4 + $0x8] sm:$0xff] }
  0x87   :  { %v74_v20 = vpop.permute.xlu1 %73  ;;  %v84_v21 = vmul.f32 %v2767_v15, %v69_v17  ;;  %v47_v17 = vld [vmem:[%s4412_s4] sm:$0xff] }
  0x88   :  { %v85_v27 = vmul.f32 %v2767_v15, %v74_v20  ;;  %v3854_v20 = vpack.c.bf16 %v48_v18, %v47_v17 }
  0x89   :  { %v3813_v30 = vadd.f32 %v2768_v19, %v84_v21  ;;  %v50_v21 = vld [vmem:[%s4412_s4 + $0x18] sm:$0xff] }
  0x8a   :  { %v3816_v32 = vadd.f32 %v2768_v19, %v85_v27  ;;  %v49_v19 = vld [vmem:[%s4412_s4 + $0x10] sm:$0xff]  ;;  %3217 = vmatpush3.bf16.msra.mxu1 %v3854_v20  ;;  %v51_v27 = vld [vmem:[%s4412_s4 + $0x20] sm:$0xff] }
  0x8b   :  { %3218 = vmatprep.subr.bf16.mxu1 %v3695_v0 }
  0xde   :  { %v172_v22 = vpop.f32.mrb[0].mxu0 }
  0xdf   :  { %v177_v25 = vrot.slane %v172_v22, 1  ;;  %v2960_v26 = vpop.f32.mrb[1].mxu0  ;;  %v178_v28 = vrot.slane %v172_v22, 2  ;;  %v184_v31 = vadd.f32 %v172_v22, %v3810_v24  ;;  %v179_v33 = vrot.slane %v172_v22, 3 }
  0xe0   :  { %v3861_v26 = vpack.c.bf16 %v50_v21, %v49_v19 }
  0xe1   :  { %v185_v29 = vadd.f32 %v177_v25, %v3808_v23  ;;  %v186_v34 = vadd.f32 %v178_v28, %v3813_v30  ;;  %v187_v35 = vadd.f32 %v179_v33, %v3816_v32  ;;  %v2770_v41 = vmul.f32 -1.442695, %v184_v31  ;;  %v52_v28 = vld [vmem:[%s4412_s4 + $0x28] sm:$0xff]  ;;  %v53_v33 = vld [vmem:[%s4412_s4 + $0x30] sm:$0xff] }
  0xe2   :  { %3220 = vmatpush3.bf16.msra.mxu1 %v3861_v26 }
  0xe3   :  { %3374 = vtanh.f32 %v185_v29  ;;  %v2771_v40 = vmul.f32 -1.442695, %v185_v29  ;;  %v2772_v42 = vmul.f32 -1.442695, %v186_v34  ;;  %v2773_v43 = vmul.f32 -1.442695, %v187_v35  ;;  %3221 = vmatprep.subr.bf16.mxu1 %v3695_v0 }
  0xe4   :  { %3376 = vtanh.f32 %v184_v31  ;;  %v3873_v31 = vpack.c.bf16 %v52_v28, %v51_v27 }
  0xe5   :  { %3378 = vtanh.f32 %v186_v34  ;;  %v54_v34 = vld [vmem:[%s4412_s4 + $0x38] sm:$0xff]  ;;  %s3700_s4 = smov 64  }
  0xe6   :  { %3380 = vtanh.f32 %v187_v35  ;;  %3223 = vmatpush3.bf16.msra.mxu1 %v3873_v31  ;;  %v3883_v35 = vpack.c.bf16 %v54_v34, %v53_v33 }
  0xe7   :  { %3382 = vpow2.f32 %v2771_v40  ;;  %3224 = vmatprep.subr.bf16.mxu1 %v3695_v0 }
  0xe8   :  { %3384 = vpow2.f32 %v2770_v41 }
  0xe9   :  { %3386 = vpow2.f32 %v2772_v42 }
  0xea   :  { %3388 = vpow2.f32 %v2773_v43  ;;  %3226 = vmatpush3.bf16.msra.mxu1 %v3883_v35 }
  0xeb   :  { %3245 = vmatprep.subr.bf16.mxu1 %v3695_v0 }
  0xed   :  { %v3375_v36 = vpop.eup %3374 }
  0xee   :  { %226 = vrot.lane.b32.xlu0 %v3375_v36, %s3699_s1  ;;  %v3377_v37 = vpop.eup %3376 }
  0xef   :  { %v3379_v38 = vpop.eup %3378 }
  0xf0   :  { %228 = vrot.lane.b32.xlu1 %v3379_v38, %s3699_s1  ;;  %v3381_v39 = vpop.eup %3380 }
  0xf1   :  { %v3383_v44 = vpop.eup %3382 }
  0xf2   :  { %224 = vrot.lane.b32.xlu0 %v3377_v37, %s3699_s1  ;;  %v3385_v45 = vpop.eup %3384  ;;  %v201_v46 = vadd.f32 1.0, %v3383_v44 }
  0xf3   :  { %v3387_v47 = vpop.eup %3386  ;;  %v200_v48 = vadd.f32 1.0, %v3385_v45 }
  0xf4   :  { %230 = vrot.lane.b32.xlu1 %v3381_v39, %s3699_s1  ;;  %v202_v49 = vadd.f32 1.0, %v3387_v47  ;;  %3390 = vrcp.f32 %v201_v46  ;;  %v3389_v50 = vpop.eup %3388 }
  0xf5   :  { %3392 = vrcp.f32 %v200_v48  ;;  %v203_v51 = vadd.f32 1.0, %v3389_v50 }
  0xf6   :  { %3394 = vrcp.f32 %v202_v49 }
  0xf7   :  { %3396 = vrcp.f32 %v203_v51 }
  0xfe   :  { %v3391_v52 = vpop.eup %3390 }
  0xff   :  { %v3824_v55 = vpop.eup %3392  ;;  %v217_v1 = vmul.f32 0.0, %v3391_v52 }
 0x100   :  { %v3395_v56 = vpop.eup %3394  ;;  %v216_v7 = vmul.f32 0.0, %v3824_v55 }
 0x101   :  { %v3397_v61 = vpop.eup %3396  ;;  %v218_v6 = vmul.f32 0.0, %v3395_v56 }
 0x102   :  { %v219_v13 = vmul.f32 0.0, %v3397_v61 }
 0x160   :  { %v227_v53 = vpop.permute.xlu0 %226 }
 0x161   :  { %v237_v54 = vmul.f32 %v3391_v52, %v227_v53 }
 0x162   :  { %v229_v57 = vpop.permute.xlu1 %228 }
 0x163   :  { %246 = vrot.lane.b32.xlu0 %v237_v54, %s3699_s1  ;;  %v238_v59 = vmul.f32 %v3395_v56, %v229_v57 }
 0x164   :  { %v225_v58 = vpop.permute.xlu0 %224 }
 0x165   :  { %v236_v60 = vmul.f32 %v3824_v55, %v225_v58  ;;  %248 = vrot.lane.b32.xlu1 %v238_v59, %s3699_s1 }
 0x166   :  { %v231_v62 = vpop.permute.xlu1 %230 }
 0x167   :  { %244 = vrot.lane.b32.xlu0 %v236_v60, %s3699_s1  ;;  %v239_v63 = vmul.f32 %v3397_v61, %v231_v62  ;;  %v3918_v62 = vld [vmem:[%s4413_s5] ss:$0 sm:$0xff] }
 0x169   :  { %250 = vrot.lane.b32.xlu1 %v239_v63, %s3699_s1 }
 0x1d5   :  { %v247_v2 = vpop.permute.xlu0 %246 }
 0x1d6   :  { %v3831_v3 = vadd.f32 %v247_v2, %v217_v1 }
 0x1d7   :  { %v249_v8 = vpop.permute.xlu1 %248 }
 0x1d8   :  { %3398 = vtanh.f32 %v3831_v3  ;;  %v3835_v11 = vadd.f32 %v249_v8, %v218_v6 }
 0x1d9   :  { %v245_v9 = vpop.permute.xlu0 %244 }
 0x1da   :  { %v3837_v12 = vadd.f32 %v245_v9, %v216_v7  ;;  %3400 = vtanh.f32 %v3835_v11 }
 0x1db   :  { %v251_v14 = vpop.permute.xlu1 %250 }
 0x1dc   :  { %3402 = vtanh.f32 %v3837_v12  ;;  %v3841_v15 = vadd.f32 %v251_v14, %v219_v13 }
 0x1de   :  { %3404 = vtanh.f32 %v3841_v15 }
 0x1e2   :  { %v3399_v16 = vpop.eup %3398 }
 0x1e3   :  { %270 = vrot.lane.b32.xlu0 %v3399_v16, %s3699_s1 }
 0x1e4   :  { %v3401_v22 = vpop.eup %3400 }
 0x1e5   :  { %272 = vrot.lane.b32.xlu1 %v3401_v22, %s3699_s1 }
 0x1e6   :  { %v3403_v25 = vpop.eup %3402 }
 0x1e7   :  { %268 = vrot.lane.b32.xlu0 %v3403_v25, %s3699_s1 }
 0x1e8   :  { %v3405_v29 = vpop.eup %3404 }
 0x1e9   :  { %274 = vrot.lane.b32.xlu1 %v3405_v29, %s3699_s1 }
 0x255   :  { %v271_v36 = vpop.permute.xlu0 %270 }
 0x256   :  { %v281_v37 = vmul.f32 %v3391_v52, %v271_v36 }
 0x257   :  { %v273_v38 = vpop.permute.xlu1 %272 }
 0x258   :  { %v282_v39 = vmul.f32 %v3395_v56, %v273_v38  ;;  %v288_v41 = vrot.slane %v281_v37, 7 }
 0x259   :  { %v269_v40 = vpop.permute.xlu0 %268 }
 0x25a   :  { %v280_v42 = vmul.f32 %v3824_v55, %v269_v40  ;;  %v291_v43 = vrot.slane %v282_v39, 6 }
 0x25b   :  { %v275_v44 = vpop.permute.xlu1 %274 }
 0x25c   :  { %v290_v45 = vsel %vm289_vm1, %v288_v41, %v280_v42  ;;  %v283_v46 = vmul.f32 %v3397_v61, %v275_v44 }
 0x25d   :  { %v293_v47 = vsel %vm292_vm2, %v291_v43, %v290_v45 }
 0x25e   :  { %v294_v48 = vrot.slane %v283_v46, 5 }
 0x260   :  { %v296_v49 = vsel %vm295_vm3, %v294_v48, %v293_v47 }
 0x261   :  { %297 = vrot.lane.b32.xlu0 %v296_v49, %s3700_s4 }
 0x2d3   :  { %v298_v50 = vpop.permute.xlu0 %297 }
 0x2d4   :  { %2989 = vmatmul.mubr.msk.f32.vlgmr.msra.gmra.mrb[2].mxu0 %vm102_vm4, %v298_v50  ;;  %v300_v51 = vsel %vm102_vm4, %v298_v50, 0.0 }
 0x2d5   :  { %2978 = vmatmul.mubr.msk.f32.vlgmr.msra.gmra.mrb[0].mxu1 %vm301_vm5, %v300_v51  ;;  %3235 = vmatpush3.bf16.msra.mxu0 %v3854_v20 }
 0x2d6   :  { %3247 = vmatpush3.bf16.msra.mxu1 %v3769_v5  ;;  %3236 = vmatprep.subr.bf16.mxu0 %v3695_v0 }
 0x2d7   :  { %3248 = vmatprep.subr.bf16.mxu1 %v3695_v0  ;;  %3018 = vmatprep.mubr.msk.f32.mxu1 %vm3696_vm0, %v3697_v4 }
 0x2d8   :  { %3007 = vmatprep.mubr.msk.f32.mxu0 %vm3696_vm0, %v3697_v4 }
 0x2d9   :  { %3238 = vmatpush3.bf16.msra.mxu0 %v3861_v26 }
 0x2da   :  { %3250 = vmatpush3.bf16.msra.mxu1 %v3782_v10  ;;  %3239 = vmatprep.subr.bf16.mxu0 %v3695_v0 }
 0x2db   :  { %3251 = vmatprep.subr.bf16.mxu1 %v3695_v0 }
 0x2dd   :  { %3241 = vmatpush3.bf16.msra.mxu0 %v3873_v31 }
 0x2de   :  { %3242 = vmatprep.subr.bf16.mxu0 %v3695_v0 }
 0x2e1   :  { %3244 = vmatpush3.bf16.msra.mxu0 %v3883_v35 }
 0x2e2   :  { %3263 = vmatprep.subr.bf16.mxu0 %v3695_v0 }
 0x3a7   :  { %v467_v52 = vpop.f32.mrb[2].mxu0 }
 0x3a8   :  { %v472_v53 = vrot.slane %v467_v52, 7  ;;  %v371_v54 = vpop.f32.mrb[0].mxu1  ;;  %v2990_v55 = vpop.f32.mrb[3].mxu0  ;;  %v473_v56 = vrot.slane %v467_v52, 1  ;;  %v474_v59 = vrot.slane %v467_v52, 2  ;;  %v480_v60 = vadd.f32 %v467_v52, %v3808_v23 }
 0x3a9   :  { %v2979_v57 = vpop.f32.mrb[1].mxu1  ;;  %v372_v1 = vadd.f32 %v3918_v62, %v371_v54  ;;  %v515_v52 = vrot.slane %v3837_v12, 7  ;;  %v516_v55 = vrot.slane %v3831_v3, 7 }
 0x3aa   :  { %v479_v58 = vadd.f32 %v472_v53, %v3810_v24  ;;  %v481_v61 = vadd.f32 %v473_v56, %v3813_v30  ;;  %v482_v63 = vadd.f32 %v474_v59, %v3816_v32  ;;  %v2778_v14 = vmul.f32 -1.442695, %v480_v60 }
 0x3ab   :  { %v2775_v18 = vmul.f32 -1.442695, %v372_v1  ;;  %v517_v56 = vrot.slane %v3835_v11, 7 }
 0x3ac   :  { %3406 = vtanh.f32 %v479_v58  ;;  %v2777_v13 = vmul.f32 -1.442695, %v479_v58  ;;  %v2779_v16 = vmul.f32 -1.442695, %v481_v61  ;;  %v2780_v17 = vmul.f32 -1.442695, %v482_v63 }
 0x3ad   :  { %3408 = vtanh.f32 %v480_v60 }
 0x3ae   :  { %3410 = vtanh.f32 %v481_v61 }
 0x3af   :  { %3412 = vtanh.f32 %v482_v63  ;;  %v518_v63 = vrot.slane %v3841_v15, 7 }
 0x3b0   :  { %3414 = vtanh.f32 %v372_v1 }
 0x3b1   :  { %3416 = vpow2.f32 %v2777_v13 }
 0x3b2   :  { %3418 = vpow2.f32 %v2778_v14 }
 0x3b3   :  { %3420 = vpow2.f32 %v2779_v16 }
 0x3b4   :  { %3422 = vpow2.f32 %v2780_v17 }
 0x3b5   :  { %3424 = vpow2.f32 %v2775_v18 }
 0x3b6   :  { %v3407_v2 = vpop.eup %3406 }
 0x3b7   :  { %531 = vrot.lane.b32.xlu1 %v3407_v2, %s3699_s1  ;;  %v3409_v6 = vpop.eup %3408 }
 0x3b8   :  { %v3411_v7 = vpop.eup %3410 }
 0x3b9   :  { %535 = vrot.lane.b32.xlu0 %v3411_v7, %s3699_s1  ;;  %v3413_v8 = vpop.eup %3412 }
 0x3ba   :  { %v3415_v9 = vpop.eup %3414 }
 0x3bb   :  { %533 = vrot.lane.b32.xlu1 %v3409_v6, %s3699_s1  ;;  %v3417_v19 = vpop.eup %3416 }
 0x3bc   :  { %v3419_v21 = vpop.eup %3418  ;;  %v495_v22 = vadd.f32 1.0, %v3417_v19 }
 0x3bd   :  { %537 = vrot.lane.b32.xlu0 %v3413_v8, %s3699_s1  ;;  %v3421_v25 = vpop.eup %3420  ;;  %v496_v27 = vadd.f32 1.0, %v3419_v21 }
 0x3be   :  { %v3423_v28 = vpop.eup %3422  ;;  %v497_v29 = vadd.f32 1.0, %v3421_v25  ;;  %3426 = vrcp.f32 %v495_v22 }
 0x3bf   :  { %384 = vrot.lane.b32.xlu1 %v3415_v9, %s3699_s1  ;;  %v3425_v33 = vpop.eup %3424  ;;  %v498_v34 = vadd.f32 1.0, %v3423_v28  ;;  %3428 = vrcp.f32 %v496_v27 }
 0x3c0   :  { %3430 = vrcp.f32 %v497_v29  ;;  %v378_v36 = vadd.f32 1.0, %v3425_v33 }
 0x3c1   :  { %3432 = vrcp.f32 %v498_v34 }
 0x3c2   :  { %3434 = vrcp.f32 %v378_v36 }
 0x3c8   :  { %v3427_v37 = vpop.eup %3426 }
 0x3c9   :  { %v3429_v40 = vpop.eup %3428  ;;  %v523_v53 = vmul.f32 %v3427_v37, %v515_v52 }
 0x3ca   :  { %v3431_v41 = vpop.eup %3430  ;;  %v524_v59 = vmul.f32 %v3429_v40, %v516_v55 }
 0x3cb   :  { %v3433_v46 = vpop.eup %3432  ;;  %v525_v58 = vmul.f32 %v3431_v41, %v517_v56 }
 0x3cc   :  { %v3435_v47 = vpop.eup %3434  ;;  %v526_v12 = vmul.f32 %v3433_v46, %v518_v63 }
 0x3cd   :  { %v382_v3 = vmul.f32 0.0, %v3435_v47 }
 0x429   :  { %v532_v38 = vpop.permute.xlu1 %531 }
 0x42a   :  { %v543_v39 = vmul.f32 %v3427_v37, %v532_v38 }
 0x42b   :  { %v536_v42 = vpop.permute.xlu0 %535 }
 0x42c   :  { %551 = vrot.lane.b32.xlu0 %v543_v39, %s3699_s1  ;;  %v545_v44 = vmul.f32 %v3431_v41, %v536_v42 }
 0x42d   :  { %v534_v43 = vpop.permute.xlu1 %533 }
 0x42e   :  { %v544_v45 = vmul.f32 %v3429_v40, %v534_v43  ;;  %555 = vrot.lane.b32.xlu1 %v545_v44, %s3699_s1 }
 0x42f   :  { %v538_v48 = vpop.permute.xlu0 %537 }
 0x430   :  { %553 = vrot.lane.b32.xlu0 %v544_v45, %s3699_s1  ;;  %v546_v50 = vmul.f32 %v3433_v46, %v538_v48 }
 0x431   :  { %v385_v49 = vpop.permute.xlu1 %384 }
 0x432   :  { %v387_v51 = vmul.f32 %v3435_v47, %v385_v49  ;;  %557 = vrot.lane.b32.xlu1 %v546_v50, %s3699_s1 }
 0x434   :  { %389 = vrot.lane.b32.xlu0 %v387_v51, %s3699_s1 }
 0x49e   :  { %v552_v54 = vpop.permute.xlu0 %551 }
 0x49f   :  { %v3935_v57 = vadd.f32 %v552_v54, %v523_v53 }
 0x4a0   :  { %v556_v60 = vpop.permute.xlu1 %555 }
 0x4a1   :  { %3436 = vtanh.f32 %v3935_v57  ;;  %v3939_v1 = vadd.f32 %v556_v60, %v525_v58 }
 0x4a2   :  { %v554_v61 = vpop.permute.xlu0 %553 }
 0x4a3   :  { %v3941_v2 = vadd.f32 %v554_v61, %v524_v59  ;;  %3438 = vtanh.f32 %v3939_v1 }
 0x4a4   :  { %v558_v11 = vpop.permute.xlu1 %557 }
 0x4a5   :  { %3440 = vtanh.f32 %v3941_v2  ;;  %v3945_v7 = vadd.f32 %v558_v11, %v526_v12 }
 0x4a6   :  { %v390_v6 = vpop.permute.xlu0 %389 }
 0x4a7   :  { %v3947_v8 = vadd.f32 %v390_v6, %v382_v3  ;;  %3442 = vtanh.f32 %v3945_v7 }
 0x4a9   :  { %3444 = vtanh.f32 %v3947_v8 }
 0x4ab   :  { %v3437_v15 = vpop.eup %3436 }
 0x4ac   :  { %575 = vrot.lane.b32.xlu1 %v3437_v15, %s3699_s1 }
 0x4ad   :  { %v3439_v9 = vpop.eup %3438 }
 0x4ae   :  { %579 = vrot.lane.b32.xlu0 %v3439_v9, %s3699_s1 }
 0x4af   :  { %v3441_v13 = vpop.eup %3440 }
 0x4b0   :  { %577 = vrot.lane.b32.xlu1 %v3441_v13, %s3699_s1 }
 0x4b1   :  { %v3443_v14 = vpop.eup %3442 }
 0x4b2   :  { %581 = vrot.lane.b32.xlu0 %v3443_v14, %s3699_s1 }
 0x4b3   :  { %v3445_v16 = vpop.eup %3444 }
 0x4b4   :  { %395 = vrot.lane.b32.xlu1 %v3445_v16, %s3699_s1 }
 0x51e   :  { %v576_v17 = vpop.permute.xlu1 %575 }
 0x51f   :  { %v587_v18 = vmul.f32 %v3427_v37, %v576_v17 }
 0x520   :  { %v580_v19 = vpop.permute.xlu0 %579 }
 0x521   :  { %v589_v21 = vmul.f32 %v3431_v41, %v580_v19  ;;  %v709_v25 = vrot.slane %v587_v18, 1 }
 0x522   :  { %v578_v22 = vpop.permute.xlu1 %577 }
 0x523   :  { %v588_v27 = vmul.f32 %v3429_v40, %v578_v22  ;;  %v711_v28 = vrot.slane %v589_v21, 7  ;;  %v597_v36 = vrot.slane %v589_v21, 6 }
 0x524   :  { %v582_v33 = vpop.permute.xlu0 %581 }
 0x525   :  { %v595_v29 = vrot.slane %v588_v27, 7  ;;  %v710_v34 = vsel %vm289_vm1, %v588_v27, %v709_v25  ;;  %v590_v38 = vmul.f32 %v3433_v46, %v582_v33 }
 0x526   :  { %v396_v39 = vpop.permute.xlu1 %395  ;;  %v712_v43 = vsel %vm292_vm2, %v711_v28, %v710_v34 }
 0x527   :  { %v398_v42 = vmul.f32 %v3435_v47, %v396_v39  ;;  %v596_v44 = vsel %vm292_vm2, %v595_v29, %v587_v18  ;;  %v599_v37 = vrot.slane %v590_v38, 5  ;;  %v713_v45 = vrot.slane %v590_v38, 6 }
 0x528   :  { %v598_v41 = vsel %vm295_vm3, %v597_v36, %v596_v44 }
 0x529   :  { %v714_v40 = vsel %vm295_vm3, %v713_v45, %v712_v43  ;;  %v601_v48 = vsel %vm600_vm6, %v599_v37, %v598_v41  ;;  %v606_v49 = vrot.slane %v398_v42, 7 }
 0x52a   :  { %715 = vrot.lane.b32.xlu0 %v714_v40, %s3700_s4  ;;  %602 = vrot.lane.b32.xlu1 %v601_v48, %s3700_s4 }
 0x52e   :  { %607 = vrot.lane.b32.xlu0 %v606_v49, %s3701_s27 }
 0x59c   :  { %v716_v46 = vpop.permute.xlu0 %715  ;;  %v603_v47 = vpop.permute.xlu1 %602 }
 0x59d   :  { %3019 = vmatmul.mubr.msk.f32.vlgmr.msra.gmra.mrb[2].mxu1 %vm102_vm4, %v716_v46 }
 0x59e   :  { %3253 = vmatpush3.bf16.msra.mxu1 %v3854_v20  ;;  %3037 = vmatprep.mubr.msk.f32.mxu1 %vm3696_vm0, %v3697_v4 }
 0x59f   :  { %3254 = vmatprep.subr.bf16.mxu1 %v3695_v0 }
 0x5a0   :  { %v608_v50 = vpop.permute.xlu0 %607 }
 0x5a1   :  { %v610_v51 = vsel %vm102_vm4, %v603_v47, %v608_v50 }
 0x5a2   :  { %v612_v52 = vrot.slane %v610_v51, 1  ;;  %3256 = vmatpush3.bf16.msra.mxu1 %v3861_v26 }
 0x5a3   :  { %3257 = vmatprep.subr.bf16.mxu1 %v3695_v0 }
 0x5a4   :  { %3008 = vmatmul.mubr.msk.f32.vlgmr.msra.gmra.mrb[4].mxu0 %vm301_vm5, %v612_v52 }
 0x5a5   :  { %3265 = vmatpush3.bf16.msra.mxu0 %v3769_v5  ;;  %3048 = vmatprep.mubr.msk.f32.mxu0 %vm3696_vm0, %v3697_v4 }
 0x5a6   :  { %3266 = vmatprep.subr.bf16.mxu0 %v3695_v0  ;;  %3259 = vmatpush3.bf16.msra.mxu1 %v3873_v31 }
 0x5a7   :  { %3260 = vmatprep.subr.bf16.mxu1 %v3695_v0 }
 0x5a9   :  { %3268 = vmatpush3.bf16.msra.mxu0 %v3782_v10 }
 0x5aa   :  { %3262 = vmatpush3.bf16.msra.mxu1 %v3883_v35  ;;  %3269 = vmatprep.subr.bf16.mxu0 %v3695_v0 }
 0x5ab   :  { %3281 = vmatprep.subr.bf16.mxu1 %v3695_v0 }
 0x670   :  { %v785_v53 = vpop.f32.mrb[2].mxu1 }
 0x671   :  { %v790_v54 = vrot.slane %v785_v53, 6  ;;  %v3020_v55 = vpop.f32.mrb[3].mxu1  ;;  %v791_v56 = vrot.slane %v785_v53, 7  ;;  %v792_v58 = vrot.slane %v785_v53, 1  ;;  %v799_v3 = vadd.f32 %v785_v53, %v3813_v30 }
 0x673   :  { %v797_v59 = vadd.f32 %v790_v54, %v3810_v24  ;;  %v798_v60 = vadd.f32 %v791_v56, %v3808_v23  ;;  %v800_v61 = vadd.f32 %v792_v58, %v3816_v32  ;;  %v2786_v19 = vmul.f32 -1.442695, %v799_v3 }
 0x674   :  { %v833_v54 = vrot.slane %v3935_v57, 7  ;;  %v834_v58 = vrot.slane %v3941_v2, 7 }
 0x675   :  { %3446 = vtanh.f32 %v797_v59  ;;  %v2784_v16 = vmul.f32 -1.442695, %v797_v59  ;;  %v2785_v17 = vmul.f32 -1.442695, %v798_v60  ;;  %v2787_v18 = vmul.f32 -1.442695, %v800_v61 }
 0x676   :  { %3448 = vtanh.f32 %v798_v60  ;;  %v836_v60 = vrot.slane %v3945_v7, 7 }
 0x677   :  { %v681_v63 = vpop.f32.mrb[4].mxu0  ;;  %3450 = vtanh.f32 %v800_v61 }
 0x678   :  { %v3009_v12 = vpop.f32.mrb[5].mxu0  ;;  %v682_v11 = vadd.f32 %v3918_v62, %v681_v63  ;;  %3452 = vtanh.f32 %v799_v3  ;;  %v835_v3 = vrot.slane %v3939_v1, 7 }
 0x67a   :  { %3454 = vtanh.f32 %v682_v11  ;;  %v2782_v21 = vmul.f32 -1.442695, %v682_v11 }
 0x67b   :  { %3456 = vpow2.f32 %v2784_v16 }
 0x67c   :  { %3458 = vpow2.f32 %v2785_v17 }
 0x67d   :  { %3460 = vpow2.f32 %v2787_v18 }
 0x67e   :  { %3462 = vpow2.f32 %v2786_v19 }
 0x67f   :  { %v3447_v6 = vpop.eup %3446  ;;  %3464 = vpow2.f32 %v2782_v21 }
 0x680   :  { %849 = vrot.lane.b32.xlu1 %v3447_v6, %s3699_s1  ;;  %v3449_v15 = vpop.eup %3448 }
 0x681   :  { %v3451_v9 = vpop.eup %3450  ;;  %851 = vrot.lane.b32.xlu0 %v3449_v15, %s3699_s1 }
 0x682   :  { %v3453_v13 = vpop.eup %3452 }
 0x684   :  { %855 = vrot.lane.b32.xlu1 %v3451_v9, %s3699_s1  ;;  %v3455_v14 = vpop.eup %3454 }
 0x685   :  { %853 = vrot.lane.b32.xlu0 %v3453_v13, %s3699_s1  ;;  %v3457_v22 = vpop.eup %3456 }
 0x686   :  { %v813_v25 = vadd.f32 1.0, %v3457_v22  ;;  %v3459_v27 = vpop.eup %3458 }
 0x687   :  { %v3461_v28 = vpop.eup %3460  ;;  %v814_v29 = vadd.f32 1.0, %v3459_v27 }
 0x688   :  { %694 = vrot.lane.b32.xlu1 %v3455_v14, %s3699_s1  ;;  %3466 = vrcp.f32 %v813_v25  ;;  %v3463_v33 = vpop.eup %3462  ;;  %v816_v34 = vadd.f32 1.0, %v3461_v28 }
 0x689   :  { %v3465_v36 = vpop.eup %3464  ;;  %v815_v38 = vadd.f32 1.0, %v3463_v33  ;;  %3468 = vrcp.f32 %v814_v29 }
 0x68a   :  { %3470 = vrcp.f32 %v816_v34  ;;  %v688_v39 = vadd.f32 1.0, %v3465_v36 }
 0x68b   :  { %3472 = vrcp.f32 %v815_v38 }
 0x68c   :  { %3474 = vrcp.f32 %v688_v39 }
 0x692   :  { %v3467_v42 = vpop.eup %3466 }
 0x693   :  { %v3469_v37 = vpop.eup %3468  ;;  %v841_v55 = vmul.f32 %v3467_v42, %v833_v54 }
 0x694   :  { %v3471_v41 = vpop.eup %3470  ;;  %v842_v61 = vmul.f32 %v3469_v37, %v834_v58 }
 0x695   :  { %v3473_v46 = vpop.eup %3472  ;;  %v844_v12 = vmul.f32 %v3471_v41, %v836_v60 }
 0x696   :  { %v3475_v50 = vpop.eup %3474  ;;  %v843_v57 = vmul.f32 %v3473_v46, %v835_v3 }
 0x697   :  { %v692_v7 = vmul.f32 %v3475_v50, %v3947_v8 }
 0x6f2   :  { %v850_v43 = vpop.permute.xlu1 %849 }
 0x6f3   :  { %v861_v44 = vmul.f32 %v3467_v42, %v850_v43  ;;  %v852_v45 = vpop.permute.xlu0 %851 }
 0x6f4   :  { %v862_v40 = vmul.f32 %v3469_v37, %v852_v45 }
 0x6f5   :  { %869 = vrot.lane.b32.xlu0 %v861_v44, %s3699_s1 }
 0x6f6   :  { %v856_v48 = vpop.permute.xlu1 %855  ;;  %871 = vrot.lane.b32.xlu1 %v862_v40, %s3699_s1 }
 0x6f7   :  { %v864_v49 = vmul.f32 %v3471_v41, %v856_v48  ;;  %v854_v47 = vpop.permute.xlu0 %853 }
 0x6f8   :  { %v863_v51 = vmul.f32 %v3473_v46, %v854_v47 }
 0x6f9   :  { %875 = vrot.lane.b32.xlu0 %v864_v49, %s3699_s1 }
 0x6fa   :  { %v695_v52 = vpop.permute.xlu1 %694  ;;  %873 = vrot.lane.b32.xlu1 %v863_v51, %s3699_s1 }
 0x6fb   :  { %v697_v53 = vmul.f32 %v3475_v50, %v695_v52 }
 0x6fd   :  { %699 = vrot.lane.b32.xlu0 %v697_v53, %s3699_s1 }
 0x767   :  { %v870_v56 = vpop.permute.xlu0 %869 }
 0x768   :  { %v4001_v59 = vadd.f32 %v870_v56, %v841_v55  ;;  %v872_v63 = vpop.permute.xlu1 %871 }
 0x769   :  { %v4006_v11 = vadd.f32 %v872_v63, %v842_v61 }
 0x76a   :  { %3476 = vtanh.f32 %v4001_v59 }
 0x76b   :  { %v876_v6 = vpop.permute.xlu0 %875  ;;  %3478 = vtanh.f32 %v4006_v11 }
 0x76c   :  { %v4008_v15 = vadd.f32 %v876_v6, %v844_v12  ;;  %v874_v2 = vpop.permute.xlu1 %873 }
 0x76d   :  { %v4013_v9 = vadd.f32 %v874_v2, %v843_v57 }
 0x76e   :  { %3480 = vtanh.f32 %v4008_v15 }
 0x76f   :  { %v700_v13 = vpop.permute.xlu0 %699  ;;  %3482 = vtanh.f32 %v4013_v9 }
 0x770   :  { %v4015_v14 = vadd.f32 %v700_v13, %v692_v7 }
 0x772   :  { %3484 = vtanh.f32 %v4015_v14 }
 0x774   :  { %v3477_v1 = vpop.eup %3476 }
 0x775   :  { %893 = vrot.lane.b32.xlu1 %v3477_v1, %s3699_s1  ;;  %v3479_v16 = vpop.eup %3478 }
 0x776   :  { %895 = vrot.lane.b32.xlu0 %v3479_v16, %s3699_s1 }
 0x778   :  { %v3481_v17 = vpop.eup %3480 }
 0x779   :  { %899 = vrot.lane.b32.xlu1 %v3481_v17, %s3699_s1  ;;  %v3483_v18 = vpop.eup %3482 }
 0x77a   :  { %897 = vrot.lane.b32.xlu0 %v3483_v18, %s3699_s1 }
 0x77c   :  { %v3485_v8 = vpop.eup %3484 }
 0x77d   :  { %705 = vrot.lane.b32.xlu1 %v3485_v8, %s3699_s1 }
 0x7e7   :  { %v894_v19 = vpop.permute.xlu1 %893 }
 0x7e8   :  { %v905_v21 = vmul.f32 %v3467_v42, %v894_v19  ;;  %v896_v22 = vpop.permute.xlu0 %895 }
 0x7e9   :  { %v906_v25 = vmul.f32 %v3469_v37, %v896_v22 }
 0x7ea   :  { %v1027_v27 = vrot.slane %v905_v21, 2 }
 0x7eb   :  { %v900_v28 = vpop.permute.xlu1 %899  ;;  %v1028_v33 = vrot.slane %v906_v25, 1  ;;  %v913_v34 = vrot.slane %v906_v25, 7 }
 0x7ec   :  { %v908_v29 = vmul.f32 %v3471_v41, %v900_v28  ;;  %v898_v36 = vpop.permute.xlu0 %897 }
 0x7ed   :  { %v907_v39 = vmul.f32 %v3473_v46, %v898_v36  ;;  %v1029_v44 = vsel %vm289_vm1, %v1028_v33, %v1027_v27  ;;  %v914_v37 = vsel %vm295_vm3, %v913_v34, %v905_v21 }
 0x7ee   :  { %v1031_v38 = vrot.slane %v908_v29, 7  ;;  %v917_v45 = vrot.slane %v908_v29, 5 }
 0x7ef   :  { %v706_v43 = vpop.permute.xlu1 %705  ;;  %v915_v48 = vrot.slane %v907_v39, 6  ;;  %v1030_v49 = vsel %vm292_vm2, %v907_v39, %v1029_v44 }
 0x7f0   :  { %v708_v40 = vmul.f32 %v3475_v50, %v706_v43  ;;  %v1032_v42 = vsel %vm295_vm3, %v1031_v38, %v1030_v49 }
 0x7f1   :  { %1033 = vrot.lane.b32.xlu0 %v1032_v42, %s3700_s4  ;;  %v916_v41 = vsel %vm600_vm6, %v915_v48, %v914_v37 }
 0x7f2   :  { %v924_v47 = vrot.slane %v708_v40, 6  ;;  %v919_v46 = vsel %vm918_vm7, %v917_v45, %v916_v41 }
 0x7f3   :  { %920 = vrot.lane.b32.xlu1 %v919_v46, %s3700_s4 }
 0x7f5   :  { %925 = vrot.lane.b32.xlu0 %v924_v47, %s3701_s27 }
 0x863   :  { %v1034_v50 = vpop.permute.xlu0 %1033 }
 0x864   :  { %3049 = vmatmul.mubr.msk.f32.vlgmr.msra.gmra.mrb[6].mxu0 %vm102_vm4, %v1034_v50 }
 0x865   :  { %3271 = vmatpush3.bf16.msra.mxu0 %v3854_v20  ;;  %3067 = vmatprep.mubr.msk.f32.mxu0 %vm3696_vm0, %v3697_v4  ;;  %v921_v51 = vpop.permute.xlu1 %920 }
 0x866   :  { %3272 = vmatprep.subr.bf16.mxu0 %v3695_v0 }
 0x867   :  { %v926_v52 = vpop.permute.xlu0 %925 }
 0x868   :  { %v928_v53 = vsel %vm102_vm4, %v921_v51, %v926_v52 }
 0x869   :  { %v930_v54 = vrot.slane %v928_v53, 2  ;;  %3274 = vmatpush3.bf16.msra.mxu0 %v3861_v26 }
 0x86a   :  { %3275 = vmatprep.subr.bf16.mxu0 %v3695_v0 }
 0x86b   :  { %3038 = vmatmul.mubr.msk.f32.vlgmr.msra.gmra.mrb[4].mxu1 %vm301_vm5, %v930_v54 }
 0x86c   :  { %3283 = vmatpush3.bf16.msra.mxu1 %v3769_v5  ;;  %3078 = vmatprep.mubr.msk.f32.mxu1 %vm3696_vm0, %v3697_v4 }
 0x86d   :  { %3284 = vmatprep.subr.bf16.mxu1 %v3695_v0  ;;  %3277 = vmatpush3.bf16.msra.mxu0 %v3873_v31 }
 0x86e   :  { %3278 = vmatprep.subr.bf16.mxu0 %v3695_v0 }
 0x870   :  { %3286 = vmatpush3.bf16.msra.mxu1 %v3782_v10 }
 0x871   :  { %3280 = vmatpush3.bf16.msra.mxu0 %v3883_v35  ;;  %3287 = vmatprep.subr.bf16.mxu1 %v3695_v0 }
 0x872   :  { %3299 = vmatprep.subr.bf16.mxu0 %v3695_v0 }
 0x937   :  { %v1103_v55 = vpop.f32.mrb[6].mxu0 }
 0x938   :  { %v1108_v56 = vrot.slane %v1103_v55, 5  ;;  %v3050_v58 = vpop.f32.mrb[7].mxu0  ;;  %v1109_v60 = vrot.slane %v1103_v55, 6  ;;  %v1110_v61 = vrot.slane %v1103_v55, 7  ;;  %v1118_v2 = vadd.f32 %v1103_v55, %v3816_v32 }
 0x93a   :  { %v1115_v63 = vadd.f32 %v1108_v56, %v3810_v24  ;;  %v1116_v12 = vadd.f32 %v1109_v60, %v3808_v23  ;;  %v1117_v3 = vadd.f32 %v1110_v61, %v3813_v30  ;;  %v2794_v22 = vmul.f32 -1.442695, %v1118_v2 }
 0x93b   :  { %v1151_v56 = vrot.slane %v4001_v59, 7  ;;  %v1152_v61 = vrot.slane %v4006_v11, 7 }
 0x93c   :  { %3486 = vtanh.f32 %v1115_v63  ;;  %v2791_v8 = vmul.f32 -1.442695, %v1115_v63  ;;  %v2792_v19 = vmul.f32 -1.442695, %v1116_v12  ;;  %v2793_v21 = vmul.f32 -1.442695, %v1117_v3 }
 0x93d   :  { %3488 = vtanh.f32 %v1116_v12  ;;  %v1153_v12 = vrot.slane %v4013_v9, 7 }
 0x93e   :  { %v999_v6 = vpop.f32.mrb[4].mxu1  ;;  %3490 = vtanh.f32 %v1117_v3 }
 0x93f   :  { %v3039_v57 = vpop.f32.mrb[5].mxu1  ;;  %v1000_v7 = vadd.f32 %v3918_v62, %v999_v6  ;;  %3492 = vtanh.f32 %v1118_v2  ;;  %v1154_v2 = vrot.slane %v4008_v15, 7 }
 0x941   :  { %3494 = vtanh.f32 %v1000_v7  ;;  %v2789_v25 = vmul.f32 -1.442695, %v1000_v7 }
 0x942   :  { %3496 = vpow2.f32 %v2791_v8 }
 0x943   :  { %3498 = vpow2.f32 %v2792_v19 }
 0x944   :  { %3500 = vpow2.f32 %v2793_v21 }
 0x945   :  { %3502 = vpow2.f32 %v2794_v22 }
 0x946   :  { %v3487_v13 = vpop.eup %3486  ;;  %3504 = vpow2.f32 %v2789_v25 }
 0x947   :  { %1167 = vrot.lane.b32.xlu1 %v3487_v13, %s3699_s1  ;;  %v3489_v1 = vpop.eup %3488 }
 0x948   :  { %v3491_v16 = vpop.eup %3490  ;;  %1169 = vrot.lane.b32.xlu0 %v3489_v1, %s3699_s1 }
 0x949   :  { %v3493_v17 = vpop.eup %3492 }
 0x94b   :  { %1171 = vrot.lane.b32.xlu1 %v3491_v16, %s3699_s1  ;;  %v3495_v18 = vpop.eup %3494 }
 0x94c   :  { %1173 = vrot.lane.b32.xlu0 %v3493_v17, %s3699_s1  ;;  %v3497_v27 = vpop.eup %3496 }
 0x94d   :  { %v1131_v28 = vadd.f32 1.0, %v3497_v27  ;;  %v3499_v29 = vpop.eup %3498 }
 0x94e   :  { %v3501_v33 = vpop.eup %3500  ;;  %v1132_v34 = vadd.f32 1.0, %v3499_v29 }
 0x94f   :  { %1012 = vrot.lane.b32.xlu1 %v3495_v18, %s3699_s1  ;;  %3506 = vrcp.f32 %v1131_v28  ;;  %v3503_v36 = vpop.eup %3502  ;;  %v1133_v38 = vadd.f32 1.0, %v3501_v33 }
 0x950   :  { %v3505_v39 = vpop.eup %3504  ;;  %v1134_v43 = vadd.f32 1.0, %v3503_v36  ;;  %3508 = vrcp.f32 %v1132_v34 }
 0x951   :  { %3510 = vrcp.f32 %v1133_v38  ;;  %v1006_v44 = vadd.f32 1.0, %v3505_v39 }
 0x952   :  { %3512 = vrcp.f32 %v1134_v43 }
 0x953   :  { %3514 = vrcp.f32 %v1006_v44 }
 0x959   :  { %v3507_v45 = vpop.eup %3506 }
 0x95a   :  { %v3509_v49 = vpop.eup %3508  ;;  %v1159_v58 = vmul.f32 %v3507_v45, %v1151_v56 }
 0x95b   :  { %v3511_v37 = vpop.eup %3510  ;;  %v1160_v3 = vmul.f32 %v3509_v49, %v1152_v61 }
 0x95c   :  { %v3513_v50 = vpop.eup %3512  ;;  %v1161_v57 = vmul.f32 %v3511_v37, %v1153_v12 }
 0x95d   :  { %v3515_v52 = vpop.eup %3514  ;;  %v1162_v59 = vmul.f32 %v3513_v50, %v1154_v2 }
 0x95e   :  { %v1010_v9 = vmul.f32 %v3515_v52, %v4015_v14 }
 0x9b9   :  { %v1168_v40 = vpop.permute.xlu1 %1167 }
 0x9ba   :  { %v1179_v48 = vmul.f32 %v3507_v45, %v1168_v40  ;;  %v1170_v42 = vpop.permute.xlu0 %1169 }
 0x9bb   :  { %v1180_v47 = vmul.f32 %v3509_v49, %v1170_v42 }
 0x9bc   :  { %1187 = vrot.lane.b32.xlu0 %v1179_v48, %s3699_s1 }
 0x9bd   :  { %v1172_v41 = vpop.permute.xlu1 %1171  ;;  %1189 = vrot.lane.b32.xlu1 %v1180_v47, %s3699_s1 }
 0x9be   :  { %v1181_v46 = vmul.f32 %v3511_v37, %v1172_v41  ;;  %v1174_v51 = vpop.permute.xlu0 %1173 }
 0x9bf   :  { %v1182_v53 = vmul.f32 %v3513_v50, %v1174_v51 }
 0x9c0   :  { %1191 = vrot.lane.b32.xlu0 %v1181_v46, %s3699_s1 }
 0x9c1   :  { %v1013_v54 = vpop.permute.xlu1 %1012  ;;  %1193 = vrot.lane.b32.xlu1 %v1182_v53, %s3699_s1 }
 0x9c2   :  { %v1015_v55 = vmul.f32 %v3515_v52, %v1013_v54 }
 0x9c4   :  { %1017 = vrot.lane.b32.xlu0 %v1015_v55, %s3699_s1 }
 0xa2e   :  { %v1188_v60 = vpop.permute.xlu0 %1187 }
 0xa2f   :  { %v4069_v63 = vadd.f32 %v1188_v60, %v1159_v58  ;;  %v1190_v6 = vpop.permute.xlu1 %1189 }
 0xa30   :  { %v4074_v7 = vadd.f32 %v1190_v6, %v1160_v3 }
 0xa31   :  { %3516 = vtanh.f32 %v4069_v63 }
 0xa32   :  { %v1192_v13 = vpop.permute.xlu0 %1191  ;;  %3518 = vtanh.f32 %v4074_v7 }
 0xa33   :  { %v4076_v1 = vadd.f32 %v1192_v13, %v1161_v57  ;;  %v1194_v11 = vpop.permute.xlu1 %1193 }
 0xa34   :  { %v4081_v16 = vadd.f32 %v1194_v11, %v1162_v59 }
 0xa35   :  { %3520 = vtanh.f32 %v4076_v1 }
 0xa36   :  { %v1018_v17 = vpop.permute.xlu0 %1017  ;;  %3522 = vtanh.f32 %v4081_v16 }
 0xa37   :  { %v4083_v18 = vadd.f32 %v1018_v17, %v1010_v9 }
 0xa39   :  { %3524 = vtanh.f32 %v4083_v18 }
 0xa3b   :  { %v3517_v15 = vpop.eup %3516 }
 0xa3c   :  { %1211 = vrot.lane.b32.xlu1 %v3517_v15, %s3699_s1  ;;  %v3519_v8 = vpop.eup %3518 }
 0xa3d   :  { %1213 = vrot.lane.b32.xlu0 %v3519_v8, %s3699_s1 }
 0xa3f   :  { %v3521_v19 = vpop.eup %3520 }
 0xa40   :  { %1215 = vrot.lane.b32.xlu1 %v3521_v19, %s3699_s1  ;;  %v3523_v21 = vpop.eup %3522 }
 0xa41   :  { %1217 = vrot.lane.b32.xlu0 %v3523_v21, %s3699_s1 }
 0xa43   :  { %v3525_v14 = vpop.eup %3524 }
 0xa44   :  { %1023 = vrot.lane.b32.xlu1 %v3525_v14, %s3699_s1 }
 0xaae   :  { %v1212_v22 = vpop.permute.xlu1 %1211 }
 0xaaf   :  { %v1223_v25 = vmul.f32 %v3507_v45, %v1212_v22  ;;  %v1214_v27 = vpop.permute.xlu0 %1213 }
 0xab0   :  { %v1224_v29 = vmul.f32 %v3509_v49, %v1214_v27 }
 0xab1   :  { %v1345_v28 = vrot.slane %v1223_v25, 3 }
 0xab2   :  { %v1216_v33 = vpop.permute.xlu1 %1215  ;;  %v1231_v36 = vrot.slane %v1224_v29, 7  ;;  %v1346_v38 = vrot.slane %v1224_v29, 2 }
 0xab3   :  { %v1225_v34 = vmul.f32 %v3511_v37, %v1216_v33  ;;  %v1218_v44 = vpop.permute.xlu0 %1217 }
 0xab4   :  { %v1226_v40 = vmul.f32 %v3513_v50, %v1218_v44  ;;  %v1347_v42 = vsel %vm289_vm1, %v1346_v38, %v1345_v28  ;;  %v1232_v47 = vsel %vm600_vm6, %v1231_v36, %v1223_v25 }
 0xab5   :  { %v1233_v39 = vrot.slane %v1225_v34, 6  ;;  %v1348_v43 = vrot.slane %v1225_v34, 1 }
 0xab6   :  { %v1024_v48 = vpop.permute.xlu1 %1023  ;;  %v1235_v49 = vrot.slane %v1226_v40, 5 }
 0xab7   :  { %v1026_v41 = vmul.f32 %v3515_v52, %v1024_v48  ;;  %v1349_v46 = vsel %vm292_vm2, %v1348_v43, %v1347_v42  ;;  %v1234_v45 = vsel %vm918_vm7, %v1233_v39, %v1232_v47 }
 0xab8   :  { %v1350_v37 = vsel %vm295_vm3, %v1226_v40, %v1349_v46  ;;  %v1237_v51 = vsel %vm1236_vm8, %v1235_v49, %v1234_v45 }
 0xab9   :  { %1351 = vrot.lane.b32.xlu0 %v1350_v37, %s3700_s4  ;;  %v1242_v53 = vrot.slane %v1026_v41, 5  ;;  %1238 = vrot.lane.b32.xlu1 %v1237_v51, %s3700_s4 }
 0xabd   :  { %1243 = vrot.lane.b32.xlu0 %v1242_v53, %s3701_s27 }
 0xb2b   :  { %v1352_v50 = vpop.permute.xlu0 %1351  ;;  %v1239_v52 = vpop.permute.xlu1 %1238 }
 0xb2c   :  { %3079 = vmatmul.mubr.msk.f32.vlgmr.msra.gmra.mrb[6].mxu1 %vm102_vm4, %v1352_v50 }
 0xb2d   :  { %3289 = vmatpush3.bf16.msra.mxu1 %v3854_v20  ;;  %3097 = vmatprep.mubr.msk.f32.mxu1 %vm3696_vm0, %v3697_v4 }
 0xb2e   :  { %3290 = vmatprep.subr.bf16.mxu1 %v3695_v0 }
 0xb2f   :  { %v1244_v54 = vpop.permute.xlu0 %1243 }
 0xb30   :  { %v1246_v55 = vsel %vm102_vm4, %v1239_v52, %v1244_v54 }
 0xb31   :  { %v1248_v56 = vrot.slane %v1246_v55, 3  ;;  %3292 = vmatpush3.bf16.msra.mxu1 %v3861_v26 }
 0xb32   :  { %3293 = vmatprep.subr.bf16.mxu1 %v3695_v0 }
 0xb33   :  { %3068 = vmatmul.mubr.msk.f32.vlgmr.msra.gmra.mrb[8].mxu0 %vm301_vm5, %v1248_v56 }
 0xb34   :  { %3301 = vmatpush3.bf16.msra.mxu0 %v3769_v5  ;;  %3108 = vmatprep.mubr.msk.f32.mxu0 %vm3696_vm0, %v3697_v4 }
 0xb35   :  { %3302 = vmatprep.subr.bf16.mxu0 %v3695_v0  ;;  %3295 = vmatpush3.bf16.msra.mxu1 %v3873_v31 }
 0xb36   :  { %3296 = vmatprep.subr.bf16.mxu1 %v3695_v0 }
 0xb38   :  { %3304 = vmatpush3.bf16.msra.mxu0 %v3782_v10 }
 0xb39   :  { %3298 = vmatpush3.bf16.msra.mxu1 %v3883_v35  ;;  %3305 = vmatprep.subr.bf16.mxu0 %v3695_v0 }
 0xb3a   :  { %3317 = vmatprep.subr.bf16.mxu1 %v3695_v0 }
 0xbff   :  { %v1421_v58 = vpop.f32.mrb[6].mxu1 }
 0xc00   :  { %v1426_v60 = vrot.slane %v1421_v58, 4  ;;  %v1427_v61 = vrot.slane %v1421_v58, 5  ;;  %v3080_v12 = vpop.f32.mrb[7].mxu1  ;;  %v1428_v3 = vrot.slane %v1421_v58, 6  ;;  %v1429_v2 = vrot.slane %v1421_v58, 7 }
 0xc02   :  { %v1434_v6 = vadd.f32 %v1426_v60, %v3810_v24  ;;  %v1435_v57 = vadd.f32 %v1427_v61, %v3808_v23  ;;  %v1436_v13 = vadd.f32 %v1428_v3, %v3813_v30  ;;  %v1437_v11 = vadd.f32 %v1429_v2, %v3816_v32 }
 0xc03   :  { %v1470_v60 = vrot.slane %v4069_v63, 7  ;;  %v1471_v61 = vrot.slane %v4074_v7, 7 }
 0xc04   :  { %3526 = vtanh.f32 %v1434_v6  ;;  %v2798_v22 = vmul.f32 -1.442695, %v1434_v6  ;;  %v2799_v25 = vmul.f32 -1.442695, %v1435_v57  ;;  %v2801_v27 = vmul.f32 -1.442695, %v1437_v11 }
 0xc05   :  { %3528 = vtanh.f32 %v1435_v57 }
 0xc06   :  { %v1317_v59 = vpop.f32.mrb[8].mxu0  ;;  %3530 = vtanh.f32 %v1436_v13 }
 0xc07   :  { %v3069_v9 = vpop.f32.mrb[9].mxu0  ;;  %v1318_v17 = vadd.f32 %v3918_v62, %v1317_v59  ;;  %3532 = vtanh.f32 %v1437_v11  ;;  %v2800_v62 = vmul.f32 -1.442695, %v1436_v13  ;;  %v1472_v59 = vrot.slane %v4076_v1, 7 }
 0xc08   :  { %v1473_v11 = vrot.slane %v4081_v16, 7 }
 0xc09   :  { %3534 = vtanh.f32 %v1318_v17  ;;  %v2796_v28 = vmul.f32 -1.442695, %v1318_v17 }
 0xc0a   :  { %3536 = vpow2.f32 %v2798_v22 }
 0xc0b   :  { %3538 = vpow2.f32 %v2799_v25 }
 0xc0c   :  { %3540 = vpow2.f32 %v2800_v62 }
 0xc0d   :  { %3542 = vpow2.f32 %v2801_v27 }
 0xc0e   :  { %v3527_v15 = vpop.eup %3526  ;;  %3544 = vpow2.f32 %v2796_v28 }
 0xc0f   :  { %v3529_v8 = vpop.eup %3528  ;;  %1486 = vrot.lane.b32.xlu1 %v3527_v15, %s3699_s1 }
 0xc10   :  { %1488 = vrot.lane.b32.xlu0 %v3529_v8, %s3699_s1  ;;  %v3531_v19 = vpop.eup %3530 }
 0xc11   :  { %v3533_v21 = vpop.eup %3532 }
 0xc13   :  { %1490 = vrot.lane.b32.xlu1 %v3531_v19, %s3699_s1  ;;  %v3535_v14 = vpop.eup %3534 }
 0xc14   :  { %1492 = vrot.lane.b32.xlu0 %v3533_v21, %s3699_s1  ;;  %v3537_v29 = vpop.eup %3536 }
 0xc15   :  { %v3539_v33 = vpop.eup %3538  ;;  %v1450_v34 = vadd.f32 1.0, %v3537_v29 }
 0xc16   :  { %v1451_v36 = vadd.f32 1.0, %v3539_v33  ;;  %v3541_v38 = vpop.eup %3540 }
 0xc17   :  { %1330 = vrot.lane.b32.xlu1 %v3535_v14, %s3699_s1  ;;  %v3543_v39 = vpop.eup %3542  ;;  %3546 = vrcp.f32 %v1450_v34  ;;  %v1452_v43 = vadd.f32 1.0, %v3541_v38 }
 0xc18   :  { %3548 = vrcp.f32 %v1451_v36  ;;  %v3545_v44 = vpop.eup %3544  ;;  %v1453_v40 = vadd.f32 1.0, %v3543_v39 }
 0xc19   :  { %3550 = vrcp.f32 %v1452_v43  ;;  %v1324_v48 = vadd.f32 1.0, %v3545_v44 }
 0xc1a   :  { %3552 = vrcp.f32 %v1453_v40 }
 0xc1b   :  { %3554 = vrcp.f32 %v1324_v48 }
 0xc21   :  { %v3547_v42 = vpop.eup %3546 }
 0xc22   :  { %v3549_v41 = vpop.eup %3548  ;;  %v1478_v12 = vmul.f32 %v3547_v42, %v1470_v60 }
 0xc23   :  { %v3551_v37 = vpop.eup %3550  ;;  %v1479_v3 = vmul.f32 %v3549_v41, %v1471_v61 }
 0xc24   :  { %v3553_v53 = vpop.eup %3552  ;;  %v1480_v9 = vmul.f32 %v3551_v37, %v1472_v59 }
 0xc25   :  { %v3555_v55 = vpop.eup %3554  ;;  %v1481_v63 = vmul.f32 %v3553_v53, %v1473_v11 }
 0xc26   :  { %v1328_v19 = vmul.f32 %v3555_v55, %v4083_v18 }
 0xc81   :  { %v1487_v47 = vpop.permute.xlu1 %1486 }
 0xc82   :  { %v1489_v46 = vpop.permute.xlu0 %1488  ;;  %v1498_v45 = vmul.f32 %v3547_v42, %v1487_v47 }
 0xc83   :  { %v1499_v49 = vmul.f32 %v3549_v41, %v1489_v46 }
 0xc84   :  { %1506 = vrot.lane.b32.xlu0 %v1498_v45, %s3699_s1 }
 0xc85   :  { %1508 = vrot.lane.b32.xlu1 %v1499_v49, %s3699_s1  ;;  %v1491_v51 = vpop.permute.xlu1 %1490 }
 0xc86   :  { %v1493_v50 = vpop.permute.xlu0 %1492  ;;  %v1500_v52 = vmul.f32 %v3551_v37, %v1491_v51 }
 0xc87   :  { %v1501_v54 = vmul.f32 %v3553_v53, %v1493_v50 }
 0xc88   :  { %1510 = vrot.lane.b32.xlu0 %v1500_v52, %s3699_s1 }
 0xc89   :  { %1512 = vrot.lane.b32.xlu1 %v1501_v54, %s3699_s1  ;;  %v1331_v56 = vpop.permute.xlu1 %1330 }
 0xc8a   :  { %v1333_v58 = vmul.f32 %v3555_v55, %v1331_v56 }
 0xc8c   :  { %1335 = vrot.lane.b32.xlu0 %v1333_v58, %s3699_s1 }
 0xcf6   :  { %v1507_v6 = vpop.permute.xlu0 %1506 }
 0xcf7   :  { %v1509_v57 = vpop.permute.xlu1 %1508  ;;  %v4137_v2 = vadd.f32 %v1507_v6, %v1478_v12 }
 0xcf8   :  { %v4139_v13 = vadd.f32 %v1509_v57, %v1479_v3 }
 0xcf9   :  { %3556 = vtanh.f32 %v4137_v2 }
 0xcfa   :  { %3558 = vtanh.f32 %v4139_v13  ;;  %v1511_v17 = vpop.permute.xlu0 %1510 }
 0xcfb   :  { %v1513_v7 = vpop.permute.xlu1 %1512  ;;  %v4145_v15 = vadd.f32 %v1511_v17, %v1480_v9 }
 0xcfc   :  { %v4147_v8 = vadd.f32 %v1513_v7, %v1481_v63 }
 0xcfd   :  { %3560 = vtanh.f32 %v4145_v15 }
 0xcfe   :  { %3562 = vtanh.f32 %v4147_v8  ;;  %v1336_v1 = vpop.permute.xlu0 %1335 }
 0xcff   :  { %v4152_v21 = vadd.f32 %v1336_v1, %v1328_v19  ;;  %v4195_v1 = vld [vmem:[%s4413_s5] ss:$0 sm:$0xff] }
 0xd01   :  { %3564 = vtanh.f32 %v4152_v21 }
 0xd03   :  { %v3557_v16 = vpop.eup %3556 }
 0xd04   :  { %v3559_v14 = vpop.eup %3558  ;;  %1530 = vrot.lane.b32.xlu1 %v3557_v16, %s3699_s1 }
 0xd05   :  { %1532 = vrot.lane.b32.xlu0 %v3559_v14, %s3699_s1 }
 0xd07   :  { %v3561_v22 = vpop.eup %3560 }
 0xd08   :  { %v3563_v25 = vpop.eup %3562  ;;  %1534 = vrot.lane.b32.xlu1 %v3561_v22, %s3699_s1 }
 0xd09   :  { %1536 = vrot.lane.b32.xlu0 %v3563_v25, %s3699_s1 }
 0xd0b   :  { %v3565_v18 = vpop.eup %3564 }
 0xd0c   :  { %1341 = vrot.lane.b32.xlu1 %v3565_v18, %s3699_s1 }
 0xd76   :  { %v1531_v62 = vpop.permute.xlu1 %1530 }
 0xd77   :  { %v1533_v27 = vpop.permute.xlu0 %1532  ;;  %v1542_v29 = vmul.f32 %v3547_v42, %v1531_v62 }
 0xd78   :  { %v1543_v28 = vmul.f32 %v3549_v41, %v1533_v27 }
 0xd79   :  { %v1664_v36 = vrot.slane %v1542_v29, 4 }
 0xd7a   :  { %v1550_v33 = vrot.slane %v1543_v28, 7  ;;  %v1665_v34 = vrot.slane %v1543_v28, 3  ;;  %v1535_v38 = vpop.permute.xlu1 %1534 }
 0xd7b   :  { %v1537_v39 = vpop.permute.xlu0 %1536  ;;  %v1544_v43 = vmul.f32 %v3551_v37, %v1535_v38 }
 0xd7c   :  { %v1545_v44 = vmul.f32 %v3553_v53, %v1537_v39  ;;  %v1551_v47 = vsel %vm918_vm7, %v1550_v33, %v1542_v29  ;;  %v1666_v51 = vsel %vm289_vm1, %v1665_v34, %v1664_v36 }
 0xd7d   :  { %v1552_v40 = vrot.slane %v1544_v43, 6  ;;  %v1667_v48 = vrot.slane %v1544_v43, 2 }
 0xd7e   :  { %v1554_v46 = vrot.slane %v1545_v44, 5  ;;  %v1669_v45 = vrot.slane %v1545_v44, 1  ;;  %v1342_v49 = vpop.permute.xlu1 %1341 }
 0xd7f   :  { %v1344_v50 = vmul.f32 %v3555_v55, %v1342_v49  ;;  %v1668_v42 = vsel %vm292_vm2, %v1667_v48, %v1666_v51  ;;  %v1553_v41 = vsel %vm1236_vm8, %v1552_v40, %v1551_v47 }
 0xd80   :  { %v1670_v52 = vsel %vm295_vm3, %v1669_v45, %v1668_v42  ;;  %v1556_v37 = vsel %vm1555_vm9, %v1554_v46, %v1553_v41 }
 0xd81   :  { %1671 = vrot.lane.b32.xlu0 %v1670_v52, %s3700_s4  ;;  %1557 = vrot.lane.b32.xlu1 %v1556_v37, %s3700_s4  ;;  %v1561_v53 = vrot.slane %v1344_v50, 4 }
 0xd85   :  { %1562 = vrot.lane.b32.xlu0 %v1561_v53, %s3701_s27 }
 0xdf3   :  { %v1672_v54 = vpop.permute.xlu0 %1671  ;;  %v1558_v55 = vpop.permute.xlu1 %1557 }
 0xdf4   :  { %3109 = vmatmul.mubr.msk.f32.vlgmr.msra.gmra.mrb[10].mxu0 %vm102_vm4, %v1672_v54 }
 0xdf5   :  { %3307 = vmatpush3.bf16.msra.mxu0 %v3854_v20  ;;  %3127 = vmatprep.mubr.msk.f32.mxu0 %vm3696_vm0, %v3697_v4 }
 0xdf6   :  { %3308 = vmatprep.subr.bf16.mxu0 %v3695_v0 }
 0xdf7   :  { %v1563_v56 = vpop.permute.xlu0 %1562 }
 0xdf8   :  { %v1565_v58 = vsel %vm102_vm4, %v1558_v55, %v1563_v56 }
 0xdf9   :  { %v1567_v60 = vrot.slane %v1565_v58, 4  ;;  %3310 = vmatpush3.bf16.msra.mxu0 %v3861_v26 }
 0xdfa   :  { %3311 = vmatprep.subr.bf16.mxu0 %v3695_v0 }
 0xdfb   :  { %3098 = vmatmul.mubr.msk.f32.vlgmr.msra.gmra.mrb[8].mxu1 %vm301_vm5, %v1567_v60 }
 0xdfc   :  { %3319 = vmatpush3.bf16.msra.mxu1 %v3769_v5  ;;  %3138 = vmatprep.mubr.msk.f32.mxu1 %vm3696_vm0, %v3697_v4 }
 0xdfd   :  { %3320 = vmatprep.subr.bf16.mxu1 %v3695_v0  ;;  %3313 = vmatpush3.bf16.msra.mxu0 %v3873_v31 }
 0xdfe   :  { %3314 = vmatprep.subr.bf16.mxu0 %v3695_v0 }
 0xe00   :  { %3322 = vmatpush3.bf16.msra.mxu1 %v3782_v10 }
 0xe01   :  { %3316 = vmatpush3.bf16.msra.mxu0 %v3883_v35  ;;  %3323 = vmatprep.subr.bf16.mxu1 %v3695_v0 }
 0xe02   :  { %3335 = vmatprep.subr.bf16.mxu0 %v3695_v0 }
 0xec7   :  { %v1741_v61 = vpop.f32.mrb[10].mxu0 }
 0xec8   :  { %v1746_v12 = vrot.slane %v1741_v61, 3  ;;  %v1747_v3 = vrot.slane %v1741_v61, 4  ;;  %v3110_v6 = vpop.f32.mrb[11].mxu0  ;;  %v1748_v57 = vrot.slane %v1741_v61, 5  ;;  %v1749_v9 = vrot.slane %v1741_v61, 6 }
 0xec9   :  { %v1791_v6 = vrot.slane %v4139_v13, 7 }
 0xeca   :  { %v1754_v59 = vadd.f32 %v1746_v12, %v3810_v24  ;;  %v1755_v11 = vadd.f32 %v1747_v3, %v3808_v23  ;;  %v1756_v63 = vadd.f32 %v1748_v57, %v3813_v30  ;;  %v1757_v7 = vadd.f32 %v1749_v9, %v3816_v32 }
 0xecb   :  { %v1790_v3 = vrot.slane %v4137_v2, 7 }
 0xecc   :  { %3566 = vtanh.f32 %v1754_v59  ;;  %v2805_v27 = vmul.f32 -1.442695, %v1754_v59  ;;  %v2806_v28 = vmul.f32 -1.442695, %v1755_v11  ;;  %v2807_v29 = vmul.f32 -1.442695, %v1756_v63 }
 0xecd   :  { %3568 = vtanh.f32 %v1755_v11  ;;  %v2808_v33 = vmul.f32 -1.442695, %v1757_v7 }
 0xece   :  { %v1636_v17 = vpop.f32.mrb[8].mxu1  ;;  %3570 = vtanh.f32 %v1756_v63 }
 0xecf   :  { %v3099_v19 = vpop.f32.mrb[9].mxu1  ;;  %v1637_v16 = vadd.f32 %v4195_v1, %v1636_v17  ;;  %3572 = vtanh.f32 %v1757_v7  ;;  %v1792_v7 = vrot.slane %v4145_v15, 7 }
 0xed0   :  { %v1793_v19 = vrot.slane %v4147_v8, 7 }
 0xed1   :  { %3574 = vtanh.f32 %v1637_v16  ;;  %v2803_v34 = vmul.f32 -1.442695, %v1637_v16 }
 0xed2   :  { %3576 = vpow2.f32 %v2805_v27 }
 0xed3   :  { %3578 = vpow2.f32 %v2806_v28 }
 0xed4   :  { %3580 = vpow2.f32 %v2807_v29 }
 0xed5   :  { %3582 = vpow2.f32 %v2808_v33 }
 0xed6   :  { %v3567_v14 = vpop.eup %3566  ;;  %3584 = vpow2.f32 %v2803_v34 }
 0xed7   :  { %v3569_v22 = vpop.eup %3568  ;;  %1806 = vrot.lane.b32.xlu1 %v3567_v14, %s3699_s1 }
 0xed8   :  { %1808 = vrot.lane.b32.xlu0 %v3569_v22, %s3699_s1  ;;  %v3571_v25 = vpop.eup %3570 }
 0xed9   :  { %v3573_v18 = vpop.eup %3572 }
 0xedb   :  { %1810 = vrot.lane.b32.xlu1 %v3571_v25, %s3699_s1  ;;  %v3575_v62 = vpop.eup %3574 }
 0xedc   :  { %1812 = vrot.lane.b32.xlu0 %v3573_v18, %s3699_s1  ;;  %v3577_v36 = vpop.eup %3576 }
 0xedd   :  { %v3579_v38 = vpop.eup %3578  ;;  %v1770_v39 = vadd.f32 1.0, %v3577_v36 }
 0xede   :  { %v1771_v43 = vadd.f32 1.0, %v3579_v38  ;;  %v3581_v44 = vpop.eup %3580 }
 0xedf   :  { %1649 = vrot.lane.b32.xlu1 %v3575_v62, %s3699_s1  ;;  %v3583_v40 = vpop.eup %3582  ;;  %3586 = vrcp.f32 %v1770_v39  ;;  %v1772_v48 = vadd.f32 1.0, %v3581_v44 }
 0xee0   :  { %3588 = vrcp.f32 %v1771_v43  ;;  %v3585_v47 = vpop.eup %3584  ;;  %v1773_v46 = vadd.f32 1.0, %v3583_v40 }
 0xee1   :  { %3590 = vrcp.f32 %v1772_v48  ;;  %v1643_v45 = vadd.f32 1.0, %v3585_v47 }
 0xee2   :  { %3592 = vrcp.f32 %v1773_v46 }
 0xee3   :  { %3594 = vrcp.f32 %v1643_v45 }
 0xee9   :  { %v3587_v49 = vpop.eup %3586 }
 0xeea   :  { %v3589_v50 = vpop.eup %3588  ;;  %v1798_v57 = vmul.f32 %v3587_v49, %v1790_v3 }
 0xeeb   :  { %v3591_v37 = vpop.eup %3590  ;;  %v1799_v11 = vmul.f32 %v3589_v50, %v1791_v6 }
 0xeec   :  { %v3593_v54 = vpop.eup %3592  ;;  %v1800_v16 = vmul.f32 %v3591_v37, %v1792_v7 }
 0xeed   :  { %v3595_v60 = vpop.eup %3594  ;;  %v1801_v14 = vmul.f32 %v3593_v54, %v1793_v19 }
 0xeee   :  { %v1647_v18 = vmul.f32 %v3595_v60, %v4152_v21 }
 0xf49   :  { %v1807_v51 = vpop.permute.xlu1 %1806 }
 0xf4a   :  { %v1809_v42 = vpop.permute.xlu0 %1808  ;;  %v1818_v41 = vmul.f32 %v3587_v49, %v1807_v51 }
 0xf4b   :  { %v1819_v52 = vmul.f32 %v3589_v50, %v1809_v42 }
 0xf4c   :  { %1826 = vrot.lane.b32.xlu0 %v1818_v41, %s3699_s1 }
 0xf4d   :  { %1828 = vrot.lane.b32.xlu1 %v1819_v52, %s3699_s1  ;;  %v1811_v53 = vpop.permute.xlu1 %1810 }
 0xf4e   :  { %v1813_v55 = vpop.permute.xlu0 %1812  ;;  %v1820_v56 = vmul.f32 %v3591_v37, %v1811_v53 }
 0xf4f   :  { %v1821_v58 = vmul.f32 %v3593_v54, %v1813_v55 }
 0xf50   :  { %1830 = vrot.lane.b32.xlu0 %v1820_v56, %s3699_s1 }
 0xf51   :  { %1832 = vrot.lane.b32.xlu1 %v1821_v58, %s3699_s1  ;;  %v1650_v61 = vpop.permute.xlu1 %1649 }
 0xf52   :  { %v1652_v12 = vmul.f32 %v3595_v60, %v1650_v61 }
 0xf54   :  { %1654 = vrot.lane.b32.xlu0 %v1652_v12, %s3699_s1 }
 0xfbe   :  { %v1827_v59 = vpop.permute.xlu0 %1826 }
 0xfbf   :  { %v4210_v9 = vadd.f32 %v1827_v59, %v1798_v57  ;;  %v1829_v63 = vpop.permute.xlu1 %1828 }
 0xfc0   :  { %v4212_v17 = vadd.f32 %v1829_v63, %v1799_v11 }
 0xfc1   :  { %3596 = vtanh.f32 %v4210_v9 }
 0xfc2   :  { %3598 = vtanh.f32 %v4212_v17  ;;  %v1831_v2 = vpop.permute.xlu0 %1830 }
 0xfc3   :  { %v4218_v13 = vadd.f32 %v1831_v2, %v1800_v16  ;;  %v1833_v22 = vpop.permute.xlu1 %1832 }
 0xfc4   :  { %v4220_v25 = vadd.f32 %v1833_v22, %v1801_v14 }
 0xfc5   :  { %3600 = vtanh.f32 %v4218_v13 }
 0xfc6   :  { %3602 = vtanh.f32 %v4220_v25  ;;  %v1655_v15 = vpop.permute.xlu0 %1654 }
 0xfc7   :  { %v4225_v62 = vadd.f32 %v1655_v15, %v1647_v18 }
 0xfc9   :  { %3604 = vtanh.f32 %v4225_v62 }
 0xfcb   :  { %v3597_v8 = vpop.eup %3596 }
 0xfcc   :  { %v3599_v27 = vpop.eup %3598  ;;  %1850 = vrot.lane.b32.xlu1 %v3597_v8, %s3699_s1 }
 0xfcd   :  { %1852 = vrot.lane.b32.xlu0 %v3599_v27, %s3699_s1 }
 0xfcf   :  { %v3601_v28 = vpop.eup %3600 }
 0xfd0   :  { %v3603_v29 = vpop.eup %3602  ;;  %1854 = vrot.lane.b32.xlu1 %v3601_v28, %s3699_s1 }
 0xfd1   :  { %1856 = vrot.lane.b32.xlu0 %v3603_v29, %s3699_s1 }
 0xfd3   :  { %v3605_v21 = vpop.eup %3604 }
 0xfd4   :  { %1660 = vrot.lane.b32.xlu1 %v3605_v21, %s3699_s1 }
0x103e   :  { %v1851_v33 = vpop.permute.xlu1 %1850 }
0x103f   :  { %v1853_v34 = vpop.permute.xlu0 %1852  ;;  %v1862_v36 = vmul.f32 %v3587_v49, %v1851_v33 }
0x1040   :  { %v1863_v38 = vmul.f32 %v3589_v50, %v1853_v34 }
0x1041   :  { %v1990_v39 = vrot.slane %v1862_v36, 5 }
0x1042   :  { %v1870_v43 = vrot.slane %v1863_v38, 7  ;;  %v1991_v44 = vrot.slane %v1863_v38, 4  ;;  %v1855_v40 = vpop.permute.xlu1 %1854 }
0x1043   :  { %v1864_v48 = vmul.f32 %v3591_v37, %v1855_v40  ;;  %v1857_v47 = vpop.permute.xlu0 %1856 }
0x1044   :  { %v1865_v46 = vmul.f32 %v3593_v54, %v1857_v47  ;;  %v1992_v42 = vsel %vm289_vm1, %v1991_v44, %v1990_v39  ;;  %v1871_v53 = vsel %vm1236_vm8, %v1870_v43, %v1862_v36 }
0x1045   :  { %v1872_v45 = vrot.slane %v1864_v48, 6  ;;  %v1993_v51 = vrot.slane %v1864_v48, 3 }
0x1046   :  { %v1995_v41 = vrot.slane %v1865_v46, 2  ;;  %v1661_v52 = vpop.permute.xlu1 %1660  ;;  %v1874_v54 = vrot.slane %v1865_v46, 5 }
0x1047   :  { %v1663_v55 = vmul.f32 %v3595_v60, %v1661_v52  ;;  %v1873_v56 = vsel %vm1555_vm9, %v1872_v45, %v1871_v53  ;;  %v1994_v49 = vsel %vm292_vm2, %v1993_v51, %v1992_v42 }
0x1048   :  { %1875 = vrot.lane.b32.xlu1 %v1873_v56, %s3700_s4  ;;  %v1996_v50 = vsel %vm295_vm3, %v1995_v41, %v1994_v49 }
0x1049   :  { %v1882_v37 = vrot.slane %v1663_v55, 3  ;;  %1997 = vrot.lane.b32.xlu0 %v1996_v50, %s3700_s4 }
0x104c   :  { %1883 = vrot.lane.b32.xlu1 %v1882_v37, %s3701_s27 }
0x104d   :  { %1877 = vrot.lane.b32.xlu0 %v1874_v54, %s3700_s4 }
0x10ba   :  { %v1876_v58 = vpop.permute.xlu1 %1875 }
0x10bb   :  { %v1998_v61 = vpop.permute.xlu0 %1997 }
0x10bc   :  { %3139 = vmatmul.mubr.msk.f32.vlgmr.msra.gmra.mrb[10].mxu1 %vm102_vm4, %v1998_v61 }
0x10bd   :  { %3325 = vmatpush3.bf16.msra.mxu1 %v3854_v20  ;;  %3157 = vmatprep.mubr.msk.f32.mxu1 %vm3696_vm0, %v3697_v4 }
0x10be   :  { %v1884_v60 = vpop.permute.xlu1 %1883  ;;  %3326 = vmatprep.subr.bf16.mxu1 %v3695_v0 }
0x10bf   :  { %v1886_v12 = vsel %vm102_vm4, %v1876_v58, %v1884_v60  ;;  %v1878_v3 = vpop.permute.xlu0 %1877 }
0x10c0   :  { %v1891_v6 = vrot.slane %v1886_v12, 5  ;;  %v1887_v57 = vsel %vm102_vm4, %v1878_v3, %v1884_v60 }
0x10c1   :  { %v1892_v59 = vrot.slane %v1887_v57, 5  ;;  %3328 = vmatpush3.bf16.msra.mxu1 %v3861_v26 }
0x10c2   :  { %3329 = vmatprep.subr.bf16.mxu1 %v3695_v0 }
0x10c3   :  { %v1893_v11 = vsel %vm1890_vm10, %v1891_v6, %v1892_v59 }
0x10c4   :  { %3128 = vmatmul.mubr.msk.f32.vlgmr.msra.gmra.mrb[12].mxu0 %vm301_vm5, %v1893_v11 }
0x10c5   :  { %3337 = vmatpush3.bf16.msra.mxu0 %v3769_v5  ;;  %3331 = vmatpush3.bf16.msra.mxu1 %v3873_v31 }
0x10c6   :  { %3338 = vmatprep.subr.bf16.mxu0 %v3695_v0  ;;  %3332 = vmatprep.subr.bf16.mxu1 %v3695_v0 }
0x10c7   :  { %3168 = vmatprep.mubr.msk.f32.mxu0 %vm3696_vm0, %v3697_v4 }
0x10c9   :  { %3340 = vmatpush3.bf16.msra.mxu0 %v3782_v10  ;;  %3334 = vmatpush3.bf16.msra.mxu1 %v3883_v35 }
0x10ca   :  { %3341 = vmatprep.subr.bf16.mxu0 %v3695_v0  ;;  %3353 = vmatprep.subr.bf16.mxu1 %v3695_v0 }
0x118f   :  { %v2067_v63 = vpop.f32.mrb[10].mxu1 }
0x1190   :  { %v2072_v7 = vrot.slane %v2067_v63, 2  ;;  %v2073_v5 = vrot.slane %v2067_v63, 3  ;;  %v3140_v19 = vpop.f32.mrb[11].mxu1  ;;  %v2074_v16 = vrot.slane %v2067_v63, 4  ;;  %v2075_v22 = vrot.slane %v2067_v63, 5 }
0x1191   :  { %v2116_v63 = vrot.slane %v4210_v9, 7 }
0x1192   :  { %v2080_v2 = vadd.f32 %v2072_v7, %v3810_v24  ;;  %v2081_v14 = vadd.f32 %v2073_v5, %v3808_v23  ;;  %v2082_v10 = vadd.f32 %v2074_v16, %v3813_v30  ;;  %v2083_v18 = vadd.f32 %v2075_v22, %v3816_v32 }
0x1193   :  { %v2117_v7 = vrot.slane %v4212_v17, 7 }
0x1194   :  { %3606 = vtanh.f32 %v2080_v2  ;;  %v2812_v36 = vmul.f32 -1.442695, %v2080_v2  ;;  %v2813_v38 = vmul.f32 -1.442695, %v2081_v14  ;;  %v2814_v39 = vmul.f32 -1.442695, %v2082_v10 }
0x1195   :  { %3608 = vtanh.f32 %v2081_v14  ;;  %v2815_v43 = vmul.f32 -1.442695, %v2083_v18 }
0x1196   :  { %3610 = vtanh.f32 %v2082_v10  ;;  %v2118_v10 = vrot.slane %v4218_v13, 7 }
0x1197   :  { %v1962_v15 = vpop.f32.mrb[12].mxu0  ;;  %3612 = vtanh.f32 %v2083_v18  ;;  %v2119_v18 = vrot.slane %v4220_v25, 7 }
0x1198   :  { %v3129_v8 = vpop.f32.mrb[13].mxu0  ;;  %v1963_v27 = vadd.f32 %v4195_v1, %v1962_v15 }
0x119a   :  { %3614 = vtanh.f32 %v1963_v27  ;;  %v2810_v44 = vmul.f32 -1.442695, %v1963_v27 }
0x119b   :  { %3616 = vpow2.f32 %v2812_v36 }
0x119c   :  { %3618 = vpow2.f32 %v2813_v38 }
0x119d   :  { %3620 = vpow2.f32 %v2814_v39 }
0x119e   :  { %v3607_v28 = vpop.eup %3606  ;;  %3622 = vpow2.f32 %v2815_v43 }
0x119f   :  { %v3609_v29 = vpop.eup %3608  ;;  %2132 = vrot.lane.b32.xlu0 %v3607_v28, %s3699_s1  ;;  %3624 = vpow2.f32 %v2810_v44 }
0x11a0   :  { %2134 = vrot.lane.b32.xlu1 %v3609_v29, %s3699_s1  ;;  %v3611_v21 = vpop.eup %3610 }
0x11a1   :  { %v3613_v33 = vpop.eup %3612 }
0x11a3   :  { %2136 = vrot.lane.b32.xlu0 %v3611_v21, %s3699_s1 }
0x11a4   :  { %2138 = vrot.lane.b32.xlu1 %v3613_v33, %s3699_s1  ;;  %v3615_v34 = vpop.eup %3614 }
0x11a5   :  { %v3617_v40 = vpop.eup %3616 }
0x11a6   :  { %v3619_v48 = vpop.eup %3618  ;;  %v2096_v47 = vadd.f32 1.0, %v3617_v40 }
0x11a7   :  { %1975 = vrot.lane.b32.xlu0 %v3615_v34, %s3699_s1  ;;  %v2097_v46 = vadd.f32 1.0, %v3619_v48  ;;  %v3621_v45 = vpop.eup %3620 }
0x11a8   :  { %v3623_v51 = vpop.eup %3622  ;;  %3626 = vrcp.f32 %v2096_v47  ;;  %v2098_v42 = vadd.f32 1.0, %v3621_v45 }
0x11a9   :  { %3628 = vrcp.f32 %v2097_v46  ;;  %v3625_v41 = vpop.eup %3624  ;;  %v2099_v52 = vadd.f32 1.0, %v3623_v51 }
0x11aa   :  { %3630 = vrcp.f32 %v2098_v42  ;;  %v1969_v53 = vadd.f32 1.0, %v3625_v41 }
0x11ab   :  { %3632 = vrcp.f32 %v2099_v52 }
0x11ac   :  { %3634 = vrcp.f32 %v1969_v53 }
0x11b2   :  { %v3627_v55 = vpop.eup %3626 }
0x11b3   :  { %v3629_v49 = vpop.eup %3628  ;;  %v2124_v5 = vmul.f32 %v3627_v55, %v2116_v63 }
0x11b4   :  { %v3631_v58 = vpop.eup %3630  ;;  %v2125_v19 = vmul.f32 %v3629_v49, %v2117_v7 }
0x11b5   :  { %v3633_v60 = vpop.eup %3632  ;;  %v2126_v15 = vmul.f32 %v3631_v58, %v2118_v10 }
0x11b6   :  { %v3635_v57 = vpop.eup %3634  ;;  %v2127_v9 = vmul.f32 %v3633_v60, %v2119_v18 }
0x11b7   :  { %v1973_v29 = vmul.f32 %v3635_v57, %v4225_v62 }
0x1211   :  { %v2133_v56 = vpop.permute.xlu0 %2132 }
0x1212   :  { %v2135_v50 = vpop.permute.xlu1 %2134  ;;  %v2144_v37 = vmul.f32 %v3627_v55, %v2133_v56 }
0x1213   :  { %v2145_v54 = vmul.f32 %v3629_v49, %v2135_v50 }
0x1214   :  { %2152 = vrot.lane.b32.xlu1 %v2144_v37, %s3699_s1 }
0x1215   :  { %2154 = vrot.lane.b32.xlu0 %v2145_v54, %s3699_s1  ;;  %v2137_v61 = vpop.permute.xlu0 %2136 }
0x1216   :  { %v2139_v12 = vpop.permute.xlu1 %2138  ;;  %v2146_v3 = vmul.f32 %v3631_v58, %v2137_v61 }
0x1217   :  { %v2147_v6 = vmul.f32 %v3633_v60, %v2139_v12 }
0x1218   :  { %2156 = vrot.lane.b32.xlu1 %v2146_v3, %s3699_s1 }
0x1219   :  { %2158 = vrot.lane.b32.xlu0 %v2147_v6, %s3699_s1  ;;  %v1976_v59 = vpop.permute.xlu0 %1975 }
0x121a   :  { %v1978_v11 = vmul.f32 %v3635_v57, %v1976_v59 }
0x121c   :  { %1980 = vrot.lane.b32.xlu1 %v1978_v11, %s3699_s1 }
0x1286   :  { %v2153_v16 = vpop.permute.xlu1 %2152 }
0x1287   :  { %v2155_v2 = vpop.permute.xlu0 %2154  ;;  %v4279_v14 = vadd.f32 %v2153_v16, %v2124_v5 }
0x1288   :  { %v4281_v22 = vadd.f32 %v2155_v2, %v2125_v19 }
0x1289   :  { %3636 = vtanh.f32 %v4279_v14 }
0x128a   :  { %3638 = vtanh.f32 %v4281_v22  ;;  %v2157_v8 = vpop.permute.xlu1 %2156 }
0x128b   :  { %v2159_v17 = vpop.permute.xlu0 %2158  ;;  %v4287_v27 = vadd.f32 %v2157_v8, %v2126_v15 }
0x128c   :  { %v4289_v28 = vadd.f32 %v2159_v17, %v2127_v9 }
0x128d   :  { %3640 = vtanh.f32 %v4287_v27 }
0x128e   :  { %3642 = vtanh.f32 %v4289_v28  ;;  %v1981_v13 = vpop.permute.xlu1 %1980 }
0x128f   :  { %v4294_v21 = vadd.f32 %v1981_v13, %v1973_v29 }
0x1291   :  { %3644 = vtanh.f32 %v4294_v21 }
0x1293   :  { %v3637_v25 = vpop.eup %3636 }
0x1294   :  { %v3639_v33 = vpop.eup %3638  ;;  %2176 = vrot.lane.b32.xlu0 %v3637_v25, %s3699_s1 }
0x1295   :  { %2178 = vrot.lane.b32.xlu1 %v3639_v33, %s3699_s1 }
0x1297   :  { %v3641_v34 = vpop.eup %3640 }
0x1298   :  { %v3643_v36 = vpop.eup %3642  ;;  %2180 = vrot.lane.b32.xlu0 %v3641_v34, %s3699_s1 }
0x1299   :  { %2182 = vrot.lane.b32.xlu1 %v3643_v36, %s3699_s1 }
0x129b   :  { %v3645_v62 = vpop.eup %3644 }
0x129c   :  { %1986 = vrot.lane.b32.xlu0 %v3645_v62, %s3699_s1 }
0x1306   :  { %v2177_v38 = vpop.permute.xlu0 %2176 }
0x1307   :  { %v2179_v39 = vpop.permute.xlu1 %2178  ;;  %v2188_v40 = vmul.f32 %v3627_v55, %v2177_v38 }
0x1308   :  { %v2189_v43 = vmul.f32 %v3629_v49, %v2179_v39 }
0x1309   :  { %v2316_v42 = vrot.slane %v2188_v40, 6 }
0x130a   :  { %v2196_v44 = vrot.slane %v2189_v43, 7  ;;  %v2181_v48 = vpop.permute.xlu0 %2180  ;;  %v2317_v51 = vrot.slane %v2189_v43, 5 }
0x130b   :  { %v2183_v46 = vpop.permute.xlu1 %2182  ;;  %v2190_v45 = vmul.f32 %v3631_v58, %v2181_v48 }
0x130c   :  { %v2197_v47 = vsel %vm1555_vm9, %v2196_v44, %v2188_v40  ;;  %v2191_v41 = vmul.f32 %v3633_v60, %v2183_v46  ;;  %v2318_v54 = vsel %vm289_vm1, %v2317_v51, %v2316_v42 }
0x130d   :  { %2201 = vrot.lane.b32.xlu1 %v2197_v47, %s3700_s4  ;;  %v2198_v52 = vrot.slane %v2190_v45, 6  ;;  %v2319_v53 = vrot.slane %v2190_v45, 4 }
0x130e   :  { %v2199_v56 = vrot.slane %v2191_v41, 5  ;;  %v1987_v50 = vpop.permute.xlu0 %1986  ;;  %v2321_v49 = vrot.slane %v2191_v41, 3 }
0x130f   :  { %v1989_v37 = vmul.f32 %v3635_v57, %v1987_v50  ;;  %v2320_v58 = vsel %vm292_vm2, %v2319_v53, %v2318_v54 }
0x1310   :  { %v2200_v55 = vsel %vm289_vm1, %v2199_v56, %v2198_v52  ;;  %v2322_v12 = vsel %vm295_vm3, %v2321_v49, %v2320_v58 }
0x1311   :  { %v2208_v61 = vrot.slane %v1989_v37, 2  ;;  %2203 = vrot.lane.b32.xlu0 %v2200_v55, %s3700_s4 }
0x1313   :  { %2209 = vrot.lane.b32.xlu1 %v2208_v61, %s3701_s27 }
0x1315   :  { %2323 = vrot.lane.b32.xlu0 %v2322_v12, %s3700_s4 }
0x137f   :  { %v2202_v60 = vpop.permute.xlu1 %2201 }
0x1383   :  { %v2204_v3 = vpop.permute.xlu0 %2203 }
0x1385   :  { %v2210_v6 = vpop.permute.xlu1 %2209 }
0x1386   :  { %v2212_v57 = vsel %vm102_vm4, %v2202_v60, %v2210_v6  ;;  %v2213_v59 = vsel %vm102_vm4, %v2204_v3, %v2210_v6  ;;  %v2443_v60 = vrot.slane %v4281_v22, 7 }
0x1387   :  { %v2217_v11 = vrot.slane %v2212_v57, 6  ;;  %v2218_v63 = vrot.slane %v2213_v59, 6  ;;  %v2324_v7 = vpop.permute.xlu0 %2323  ;;  %v2444_v59 = vrot.slane %v4287_v27, 7 }
0x1388   :  { %3169 = vmatmul.mubr.msk.f32.vlgmr.msra.gmra.mrb[14].mxu0 %vm102_vm4, %v2324_v7 }
0x1389   :  { %v2219_v5 = vsel %vm2216_vm11, %v2217_v11, %v2218_v63  ;;  %3343 = vmatpush3.bf16.msra.mxu0 %v3854_v20  ;;  %3187 = vmatprep.mubr.msk.f32.mxu0 %vm3696_vm0, %v3697_v4  ;;  %v2445_v11 = vrot.slane %v4289_v28, 7 }
0x138a   :  { %3158 = vmatmul.mubr.msk.f32.vlgmr.msra.gmra.mrb[12].mxu1 %vm301_vm5, %v2219_v5  ;;  %3344 = vmatprep.subr.bf16.mxu0 %v3695_v0 }
0x138b   :  { %3206 = vmatprep.mubr.msk.f32.mxu1 %vm3696_vm0, %v3697_v4 }
0x138d   :  { %3346 = vmatpush3.bf16.msra.mxu0 %v3861_v26 }
0x138e   :  { %3347 = vmatprep.subr.bf16.mxu0 %v3695_v0 }
0x1391   :  { %3349 = vmatpush3.bf16.msra.mxu0 %v3873_v31 }
0x1392   :  { %3350 = vmatprep.subr.bf16.mxu0 %v3695_v0 }
0x1395   :  { %3352 = vmatpush3.bf16.msra.mxu0 %v3883_v35 }
0x145b   :  { %v2393_v20 = vpop.f32.mrb[14].mxu0 }
0x145c   :  { %v2399_v19 = vrot.slane %v2393_v20, 2  ;;  %v3170_v16 = vpop.f32.mrb[15].mxu0  ;;  %v2400_v10 = vrot.slane %v2393_v20, 3  ;;  %v2401_v9 = vrot.slane %v2393_v20, 4  ;;  %v2398_v26 = vrot.slane %v2393_v20, 1 }
0x145d   :  { %v2288_v2 = vpop.f32.mrb[12].mxu1  ;;  %v2442_v16 = vrot.slane %v4279_v14, 7 }
0x145e   :  { %v2407_v18 = vadd.f32 %v2399_v19, %v3808_v23  ;;  %v3159_v15 = vpop.f32.mrb[13].mxu1  ;;  %v2408_v4 = vadd.f32 %v2400_v10, %v3813_v30  ;;  %v2409_v8 = vadd.f32 %v2401_v9, %v3816_v32  ;;  %v2289_v31 = vadd.f32 %v4195_v1, %v2288_v2 }
0x145f   :  { %v2406_v35 = vadd.f32 %v2398_v26, %v3810_v24 }
0x1460   :  { %3646 = vtanh.f32 %v2407_v18  ;;  %v2820_v32 = vmul.f32 -1.442695, %v2407_v18  ;;  %v2821_v24 = vmul.f32 -1.442695, %v2408_v4  ;;  %v2822_v25 = vmul.f32 -1.442695, %v2409_v8 }
0x1461   :  { %3648 = vtanh.f32 %v2408_v4  ;;  %v2817_v33 = vmul.f32 -1.442695, %v2289_v31  ;;  %v2819_v34 = vmul.f32 -1.442695, %v2406_v35 }
0x1462   :  { %3650 = vtanh.f32 %v2409_v8 }
0x1463   :  { %3652 = vtanh.f32 %v2289_v31 }
0x1464   :  { %3654 = vtanh.f32 %v2406_v35 }
0x1465   :  { %3656 = vpow2.f32 %v2820_v32 }
0x1466   :  { %3658 = vpow2.f32 %v2821_v24 }
0x1467   :  { %3660 = vpow2.f32 %v2822_v25 }
0x1468   :  { %3662 = vpow2.f32 %v2817_v33 }
0x1469   :  { %3664 = vpow2.f32 %v2819_v34 }
0x146a   :  { %v3647_v17 = vpop.eup %3646 }
0x146b   :  { %2460 = vrot.lane.b32.xlu1 %v3647_v17, %s3699_s1  ;;  %v3649_v23 = vpop.eup %3648 }
0x146c   :  { %v3651_v29 = vpop.eup %3650  ;;  %2462 = vrot.lane.b32.xlu0 %v3649_v23, %s3699_s1 }
0x146d   :  { %v3653_v30 = vpop.eup %3652 }
0x146e   :  { %v3655_v13 = vpop.eup %3654 }
0x146f   :  { %2464 = vrot.lane.b32.xlu1 %v3651_v29, %s3699_s1  ;;  %v3657_v36 = vpop.eup %3656 }
0x1470   :  { %2301 = vrot.lane.b32.xlu0 %v3653_v30, %s3699_s1  ;;  %v2423_v62 = vadd.f32 1.0, %v3657_v36  ;;  %v3659_v38 = vpop.eup %3658 }
0x1471   :  { %v3661_v39 = vpop.eup %3660  ;;  %v2424_v43 = vadd.f32 1.0, %v3659_v38 }
0x1472   :  { %3666 = vrcp.f32 %v2423_v62  ;;  %v3663_v44 = vpop.eup %3662  ;;  %v2425_v40 = vadd.f32 1.0, %v3661_v39 }
0x1473   :  { %2458 = vrot.lane.b32.xlu1 %v3655_v13, %s3699_s1  ;;  %v3665_v48 = vpop.eup %3664  ;;  %3668 = vrcp.f32 %v2424_v43  ;;  %v2295_v47 = vadd.f32 1.0, %v3663_v44 }
0x1474   :  { %v2422_v46 = vadd.f32 1.0, %v3665_v48  ;;  %3670 = vrcp.f32 %v2425_v40 }
0x1475   :  { %3672 = vrcp.f32 %v2295_v47 }
0x1476   :  { %3674 = vrcp.f32 %v2422_v46 }
0x147c   :  { %v3667_v45 = vpop.eup %3666 }
0x147d   :  { %v3669_v41 = vpop.eup %3668  ;;  %v2451_v3 = vmul.f32 %v3667_v45, %v2443_v60  ;;  %v2651_v60 = vld [vmem:[%s4414_s6 + $0x10] sm:$0xff] }
0x147e   :  { %v3671_v53 = vpop.eup %3670  ;;  %v2452_v63 = vmul.f32 %v3669_v41, %v2444_v59  ;;  %v2653_v59 = vld [vmem:[%s4414_s6 + $0x20] sm:$0xff] }
0x147f   :  { %v3673_v54 = vpop.eup %3672  ;;  %v2453_v5 = vmul.f32 %v3671_v53, %v2445_v11  ;;  %v2654_v11 = vld [vmem:[%s4414_s6 + $0x28] sm:$0xff] }
0x1480   :  { %v3675_v55 = vpop.eup %3674  ;;  %v2299_v10 = vmul.f32 %v3673_v54, %v4294_v21 }
0x1481   :  { %v2450_v18 = vmul.f32 %v3675_v55, %v2442_v16 }
0x14dd   :  { %v2461_v51 = vpop.permute.xlu1 %2460 }
0x14de   :  { %v2471_v42 = vmul.f32 %v3667_v45, %v2461_v51  ;;  %v2463_v52 = vpop.permute.xlu0 %2462 }
0x14df   :  { %v2472_v56 = vmul.f32 %v3669_v41, %v2463_v52 }
0x14e0   :  { %2480 = vrot.lane.b32.xlu0 %v2471_v42, %s3699_s1 }
0x14e1   :  { %v2465_v50 = vpop.permute.xlu1 %2464  ;;  %2482 = vrot.lane.b32.xlu1 %v2472_v56, %s3699_s1 }
0x14e2   :  { %v2473_v37 = vmul.f32 %v3671_v53, %v2465_v50  ;;  %v2302_v49 = vpop.permute.xlu0 %2301 }
0x14e3   :  { %v2304_v61 = vmul.f32 %v3673_v54, %v2302_v49 }
0x14e4   :  { %2484 = vrot.lane.b32.xlu0 %v2473_v37, %s3699_s1 }
0x14e5   :  { %v2459_v58 = vpop.permute.xlu1 %2458  ;;  %2306 = vrot.lane.b32.xlu1 %v2304_v61, %s3699_s1 }
0x14e6   :  { %v2470_v12 = vmul.f32 %v3675_v55, %v2459_v58 }
0x14e8   :  { %2478 = vrot.lane.b32.xlu0 %v2470_v12, %s3699_s1  ;;  %v2650_v12 = vld [vmem:[%s4414_s6 + $0x8] sm:$0xff] }
0x1552   :  { %v2481_v6 = vpop.permute.xlu0 %2480 }
0x1553   :  { %v2491_v57 = vadd.f32 %v2481_v6, %v2451_v3  ;;  %v2483_v7 = vpop.permute.xlu1 %2482  ;;  %v2652_v6 = vld [vmem:[%s4414_s6 + $0x18] sm:$0xff] }
0x1554   :  { %v2492_v20 = vadd.f32 %v2483_v7, %v2452_v63  ;;  %v3360_v7 = vpack.c.bf16 %v2654_v11, %v2653_v59 }
0x1555   :  { %3676 = vtanh.f32 %v2491_v57  ;;  %v3357_v57 = vpack.c.bf16 %v2652_v6, %v2651_v60 }
0x1556   :  { %v2485_v19 = vpop.permute.xlu0 %2484  ;;  %3678 = vtanh.f32 %v2492_v20  ;;  %v2656_v20 = vld [vmem:[%s4414_s6 + $0x38] sm:$0xff] }
0x1557   :  { %v2493_v2 = vadd.f32 %v2485_v19, %v2453_v5  ;;  %v2307_v22 = vpop.permute.xlu1 %2306  ;;  %v2655_v5 = vld [vmem:[%s4414_s6 + $0x30] sm:$0xff] }
0x1558   :  { %v2309_v15 = vadd.f32 %v2307_v22, %v2299_v10  ;;  %v3363_v19 = vpack.c.bf16 %v2656_v20, %v2655_v5 }
0x1559   :  { %3680 = vtanh.f32 %v2493_v2 }
0x155a   :  { %v2479_v9 = vpop.permute.xlu0 %2478  ;;  %3682 = vtanh.f32 %v2309_v15 }
0x155b   :  { %v2490_v27 = vadd.f32 %v2479_v9, %v2450_v18 }
0x155d   :  { %3684 = vtanh.f32 %v2490_v27 }
0x155f   :  { %v3677_v28 = vpop.eup %3676 }
0x1560   :  { %2504 = vrot.lane.b32.xlu1 %v3677_v28, %s3699_s1  ;;  %v3679_v4 = vpop.eup %3678  ;;  %v15_v28 = vstv %s4415_s9 }
0x1561   :  { %2506 = vrot.lane.b32.xlu0 %v3679_v4, %s3699_s1  ;;  %16 = vst [vmem:[#allocation2] sm:$0x1] %v15_v28  ;;  %v2825_v4 = vld [vmem:[%s4416_s7] ss:$0 sm:$0xff] }
0x1563   :  { %v3681_v26 = vpop.eup %3680 }
0x1564   :  { %2508 = vrot.lane.b32.xlu1 %v3681_v26, %s3699_s1  ;;  %v3683_v14 = vpop.eup %3682 }
0x1565   :  { %2312 = vrot.lane.b32.xlu0 %v3683_v14, %s3699_s1  ;;  %v2827_v14 = vld [vmem:[%s4417_s8] ss:$0 sm:$0xff] }
0x1567   :  { %v3685_v8 = vpop.eup %3684 }
0x1568   :  { %2502 = vrot.lane.b32.xlu1 %v3685_v8, %s3699_s1 }
0x15d2   :  { %v2505_v21 = vpop.permute.xlu1 %2504 }
0x15d3   :  { %v2515_v31 = vmul.f32 %v3667_v45, %v2505_v21  ;;  %v2507_v35 = vpop.permute.xlu0 %2506 }
0x15d4   :  { %v2516_v17 = vmul.f32 %v3669_v41, %v2507_v35 }
0x15d5   :  { %v2522_v23 = vrot.slane %v2515_v31, 7 }
0x15d6   :  { %v2509_v29 = vpop.permute.xlu1 %2508  ;;  %v2523_v13 = vrot.slane %v2516_v17, 6  ;;  %v2828_v17 = vld [vmem:[#allocation2] ss:$0 sm:$0xff] }
0x15d7   :  { %v2517_v30 = vmul.f32 %v3671_v53, %v2509_v29  ;;  %v2313_v24 = vpop.permute.xlu0 %2312 }
0x15d8   :  { %v2524_v25 = vsel %vm289_vm1, %v2523_v13, %v2522_v23  ;;  %v2315_v34 = vmul.f32 %v3673_v54, %v2313_v24 }
0x15d9   :  { %v2525_v32 = vrot.slane %v2517_v30, 5 }
0x15da   :  { %v2503_v33 = vpop.permute.xlu1 %2502  ;;  %v2534_v38 = vrot.slane %v2315_v34, 1 }
0x15db   :  { %v2514_v36 = vmul.f32 %v3675_v55, %v2503_v33  ;;  %v2526_v62 = vsel %vm292_vm2, %v2525_v32, %v2524_v25 }
0x15dc   :  { %2529 = vrot.lane.b32.xlu1 %v2526_v62, %s3700_s4 }
0x15dd   :  { %2527 = vrot.lane.b32.xlu0 %v2514_v36, %s3700_s4 }
0x15e1   :  { %2535 = vrot.lane.b32.xlu0 %v2534_v38, %s3701_s27 }
0x164e   :  { %v2530_v43 = vpop.permute.xlu1 %2529 }
0x164f   :  { %v2528_v39 = vpop.permute.xlu0 %2527 }
0x1653   :  { %v2536_v44 = vpop.permute.xlu0 %2535 }
0x1654   :  { %v2538_v40 = vsel %vm102_vm4, %v2528_v39, %v2536_v44  ;;  %v2539_v48 = vsel %vm102_vm4, %v2530_v43, %v2536_v44 }
0x1655   :  { %v2543_v47 = vrot.slane %v2538_v40, 7  ;;  %v2544_v46 = vrot.slane %v2539_v48, 7 }
0x1657   :  { %v2545_v45 = vsel %vm2542_vm12, %v2543_v47, %v2544_v46 }
0x1658   :  { %3188 = vmatmul.mubr.msk.f32.vlgmr.msra.gmra.mrb[16].mxu0 %vm301_vm5, %v2545_v45 }
0x172b   :  { %v2614_v51 = vpop.f32.mrb[16].mxu0 }
0x172c   :  { %v2615_v42 = vadd.f32 %v4195_v1, %v2614_v51  ;;  %v3189_v41 = vpop.f32.mrb[17].mxu0  ;;  %v2649_v1 = vld [vmem:[%s4414_s6] sm:$0xff] }
0x172d   :  { %v3354_v3 = vpack.c.bf16 %v2650_v12, %v2649_v1 }
0x172e   :  { %3686 = vtanh.f32 %v2615_v42  ;;  %v2824_v53 = vmul.f32 -1.442695, %v2615_v42 }
0x172f   :  { %3355 = vmatpush3.bf16.msra.mxu1 %v3354_v3 }
0x1730   :  { %3688 = vpow2.f32 %v2824_v53  ;;  %3356 = vmatprep.subr.bf16.mxu1 %v3695_v0 }
0x1733   :  { %3358 = vmatpush3.bf16.msra.mxu1 %v3357_v57 }
0x1734   :  { %3359 = vmatprep.subr.bf16.mxu1 %v3695_v0 }
0x1737   :  { %3361 = vmatpush3.bf16.msra.mxu1 %v3360_v7 }
0x1738   :  { %v3687_v52 = vpop.eup %3686  ;;  %3362 = vmatprep.subr.bf16.mxu1 %v3695_v0 }
0x1739   :  { %2627 = vrot.lane.b32.xlu1 %v3687_v52, %s3699_s1 }
0x173a   :  { %v3689_v56 = vpop.eup %3688 }
0x173b   :  { %v2621_v50 = vadd.f32 1.0, %v3689_v56  ;;  %3364 = vmatpush3.bf16.msra.mxu1 %v3363_v19 }
0x173d   :  { %3690 = vrcp.f32 %v2621_v50 }
0x1747   :  { %v3691_v37 = vpop.eup %3690 }
0x1748   :  { %v2625_v55 = vmul.f32 %v3691_v37, %v2309_v15 }
0x17ab   :  { %v2628_v54 = vpop.permute.xlu1 %2627 }
0x17ac   :  { %v2630_v49 = vmul.f32 %v3691_v37, %v2628_v54 }
0x17ae   :  { %2632 = vrot.lane.b32.xlu0 %v2630_v49, %s3699_s1 }
0x1820   :  { %v2633_v61 = vpop.permute.xlu0 %2632 }
0x1821   :  { %v2635_v58 = vadd.f32 %v2633_v61, %v2625_v55 }
0x1823   :  { %3692 = vtanh.f32 %v2635_v58 }
0x182d   :  { %v3693_v63 = vpop.eup %3692 }
0x182e   :  { %2638 = vrot.lane.b32.xlu1 %v3693_v63, %s3699_s1 }
0x18a0   :  { %v2639_v16 = vpop.permute.xlu1 %2638 }
0x18a1   :  { %v2641_v2 = vmul.f32 %v3691_v37, %v2639_v16 }
0x18a3   :  { %v2643_v10 = vrot.slane %v2641_v2, 1 }
0x18a5   :  { %2644 = vrot.lane.b32.xlu0 %v2643_v10, %s3701_s27 }
0x1917   :  { %v2645_v22 = vpop.permute.xlu0 %2644 }
0x1918   :  { %v2647_v18 = vsel %vm102_vm4, %v2528_v39, %v2645_v22  ;;  %v2648_v0 = vsel %vm102_vm4, %v2530_v43, %v2645_v22 }
0x1919   :  { %v2666_v15 = vrot.slane %v2647_v18, 7  ;;  %v2667_v9 = vrot.slane %v2648_v0, 7 }
0x191b   :  { %v2668_v27 = vsel %vm2542_vm12, %v2666_v15, %v2667_v9 }
0x191c   :  { %3207 = vmatmul.mubr.msk.f32.vlgmr.msra.gmra.mrb[14].mxu1 %vm301_vm5, %v2668_v27 }
0x19ef   :  { %v2737_v26 = vpop.f32.mrb[14].mxu1 }
0x19f0   :  { %v2738_v8 = vadd.f32 %v2825_v4, %v2737_v26  ;;  %v3208_v21 = vpop.f32.mrb[15].mxu1 }
0x19f2   :  { %v2748_v31 = vmul.f32 %v2827_v14, %v2738_v8 }
0x19f4   :  { %v2750_v35 = vsel %vm2749_vm13, %v2748_v31, 0.0 }
0x19f5   :  { %2751 = vadd.xlane.f32.xlu1 %v2750_v35 }
0x1a82   :  { %v2752_v23 = vpop.xlane.xlu1 %2751 }
0x1a83   :  { %v2760_v29 = vadd.f32 %v2828_v17, %v2752_v23 }
0x1a85   :  { %2762 = vst.msk [vmem:[%s4418_s10] sm:$0xf] %vm2761_vm14, %v2760_v29 }

</bundles_post_ra>
